<compile_context>
chip_gen: v5e
topology: v5e:2x2
jax: 0.10.0
libtpu: 0.0.40
codegen_flags: <defaults>
</compile_context>

<pallas_src>
import math
import functools

import jax
import jax.numpy as jnp
from jax.experimental import pallas as pl
from jax.experimental.pallas import tpu as pltpu


def _encoding_layer_kernel(
    x_ref,        # (Bt, S, D) f32
    mask_ref,     # (Bt, 1, S) f32 additive key-padding bias (0 or -1e30)
    vecs_ref,     # (9, D)  f32: ln1_g, ln1_b, ln2_g, ln2_b, bo, b2, bq(scaled), bk, bv
    b1_ref,       # (1, F)  f32
    wqkv_ref,     # (D, 3D) bf16  (q columns pre-scaled by 1/sqrt(Dh))
    wo_ref,       # (D, D)  bf16
    w1_ref,       # (D, F)  bf16
    w2_ref,       # (F, D)  bf16
    out_ref,      # (Bt, S, D) f32
    ctx_ref,      # scratch VMEM (Bt*S, D) f32 — per-head attention context slab
    *, num_heads, eps,
):
    bt, S, D = x_ref.shape
    H = num_heads
    Dh = D // H
    N = bt * S

    x = x_ref[...].reshape(N, D)                       # f32 residual stream

    vecs = vecs_ref[...]                               # (9, D) f32
    ln1_g, ln1_b = vecs[0:1, :], vecs[1:2, :]
    ln2_g, ln2_b = vecs[2:3, :], vecs[3:4, :]
    bo, b2 = vecs[4:5, :], vecs[5:6, :]
    bq, bk, bv = vecs[6:7, :], vecs[7:8, :], vecs[8:9, :]

    def layer_norm(v, g, b):
        mu = jnp.mean(v, axis=-1, keepdims=True)
        c = v - mu
        var = jnp.mean(c * c, axis=-1, keepdims=True)
        return c * jax.lax.rsqrt(var + eps) * g + b

    # ---- LN1 + fused QKV projection (single MXU matmul, bf16 in / f32 acc) ----
    xn = layer_norm(x, ln1_g, ln1_b)
    qkv = jnp.dot(xn.astype(jnp.bfloat16), wqkv_ref[...],
                  preferred_element_type=jnp.float32)              # (N, 3D)
    q = (qkv[:, 0:D] + bq).astype(jnp.bfloat16)        # already scaled by 1/sqrt(Dh)
    k = (qkv[:, D:2 * D] + bk).astype(jnp.bfloat16)
    v = (qkv[:, 2 * D:3 * D] + bv).astype(jnp.bfloat16)

    mask = mask_ref[...]                               # (bt, 1, S)

    # ---- multi-head self-attention: per (batch, head) score tile, context written
    #      into the VMEM slab at its lane offset (no lane-axis concat). -------------
    for b in range(bt):
        rs = slice(b * S, (b + 1) * S)
        qb, kb, vb = q[rs, :], k[rs, :], v[rs, :]
        mb = mask[b]                                   # (1, S)
        for h in range(H):
            cs = slice(h * Dh, (h + 1) * Dh)
            # scores = q_h @ k_h^T  (contract last dims; no explicit transpose)
            s = jax.lax.dot_general(qb[:, cs], kb[:, cs],
                                    (((1,), (1,)), ((), ())),
                                    preferred_element_type=jnp.float32)   # (S, S)
            s = s + mb                                 # key-padding bias, bcast rows
            m = jnp.max(s, axis=-1, keepdims=True)
            p = jnp.exp(s - m)
            p = p * pl.reciprocal(jnp.sum(p, axis=-1, keepdims=True), approx=True)
            ctx_ref[rs, cs] = jnp.dot(p.astype(jnp.bfloat16), vb[:, cs],
                                      preferred_element_type=jnp.float32)

    # Single output projection over the whole (Bt*S, D) slab.
    attn = jnp.dot(ctx_ref[...].astype(jnp.bfloat16), wo_ref[...],
                   preferred_element_type=jnp.float32) + bo
    x = x + attn                                       # dropout = identity (eval)

    # ---- LN2 + feed-forward (Linear -> SiLU -> Linear) --------------------------
    xn2 = layer_norm(x, ln2_g, ln2_b)
    h1 = jnp.dot(xn2.astype(jnp.bfloat16), w1_ref[...],
                 preferred_element_type=jnp.float32) + b1_ref[...]
    h1 = h1 * pl.reciprocal(1.0 + jnp.exp(-h1), approx=True)       # SiLU (EUP rcp)
    ff = jnp.dot(h1.astype(jnp.bfloat16), w2_ref[...],
                 preferred_element_type=jnp.float32) + b2

    out_ref[...] = (x + ff).reshape(bt, S, D).astype(out_ref.dtype)


def prepare_params(p, *, num_heads):
    """Convert natural (unfused, unscaled, f32, (in,out)-layout) params to kernel layout."""
    D = p["wq"].shape[0]
    Dh = D // num_heads
    scale = jnp.float32(1.0 / math.sqrt(Dh))
    wqkv = jnp.concatenate([p["wq"] * scale, p["wk"], p["wv"]], axis=1)   # (D, 3D)
    vecs = jnp.concatenate([
        p["ln1_g"], p["ln1_b"], p["ln2_g"], p["ln2_b"],
        p["bo"], p["b2"],
        p["bq"] * scale, p["bk"], p["bv"]], axis=0)                       # (9, D)
    return {
        "vecs": vecs.astype(jnp.float32),
        "b1": p["b1"].astype(jnp.float32),
        "wqkv": wqkv.astype(jnp.bfloat16),
        "wo": p["wo"].astype(jnp.bfloat16),
        "w1": p["w1"].astype(jnp.bfloat16),
        "w2": p["w2"].astype(jnp.bfloat16),
    }


def encoding_layer_forward(x, kp, key_padding_mask=None, *, num_heads, eps=1e-5,
                           block_b=None):
    """Pallas equivalent of EncodingLayer.forward (inference / eval mode).

    kp: output of prepare_params.  key_padding_mask: optional bool (B, S),
    True = ignore (PyTorch convention).
    """
    B, S, D = x.shape
    F = kp["b1"].shape[1]
    assert D % num_heads == 0

    # Batch rows per grid step: aim for Bt*S >= 256 rows (feed the MXU M dim,
    # amortize per-step overhead) while keeping Bt a divisor of B.
    if block_b is None:
        target = max(1, -(-256 // S))          # cdiv(256, S)
        block_b = 1
        for cand in range(1, B + 1):
            if B % cand == 0 and cand <= target:
                block_b = cand
    bt = block_b
    assert B % bt == 0

    if key_padding_mask is None:
        mask_bias = jnp.zeros((B, 1, S), jnp.float32)
    else:
        mask_bias = jnp.where(key_padding_mask.reshape(B, 1, S),
                              jnp.float32(-1e30), jnp.float32(0.0))

    kernel = functools.partial(_encoding_layer_kernel, num_heads=num_heads, eps=eps)

    def resident(shape):
        # Grid-invariant operand: constant index_map -> fetched HBM->VMEM once.
        return pl.BlockSpec(shape, lambda b: (0,) * len(shape))

    in_specs = [
        pl.BlockSpec((bt, S, D), lambda b: (b, 0, 0)),   # x
        pl.BlockSpec((bt, 1, S), lambda b: (b, 0, 0)),   # additive key-padding bias
        resident((9, D)),                                # packed LN params + biases
        resident((1, F)),                                # b1
        resident((D, 3 * D)),                            # fused qkv weight (bf16)
        resident((D, D)),                                # wo (bf16)
        resident((D, F)),                                # w1 (bf16)
        resident((F, D)),                                # w2 (bf16)
    ]

    # Explicit VMEM budget with headroom, clamped to 64 MiB (valid on v7x too).
    est = (
        2 * (4 * bt * S * D * 2                      # x + out blocks (double-buffered)
             + 4 * bt * S                            # mask block
             + 2 * (3 * D * D + D * D + 2 * D * F)   # bf16 weights (double-buffered)
             + 4 * (9 * D + F))                      # packed vectors
        + 4 * bt * S * (4 * D + F) * 3               # rough working set (qkv/ctx/ffn)
    )
    vmem_limit = int(min(max(est, 32 * 1024 * 1024), 64 * 1024 * 1024))

    return pl.pallas_call(
        kernel,
        out_shape=jax.ShapeDtypeStruct((B, S, D), x.dtype),
        grid=(B // bt,),
        in_specs=in_specs,
        out_specs=pl.BlockSpec((bt, S, D), lambda b: (b, 0, 0)),
        scratch_shapes=[pltpu.VMEM((bt * S, D), jnp.float32)],
        compiler_params=pltpu.CompilerParams(
            dimension_semantics=("parallel",),
            vmem_limit_bytes=vmem_limit,
        ),
    )(x, mask_bias, kp["vecs"], kp["b1"], kp["wqkv"], kp["wo"], kp["w1"], kp["w2"])


def _reference_forward(x, params, key_padding_mask, *, num_heads, eps=1e-5):
    """Pure-JAX f32 reference matching the PyTorch module in eval mode."""
    B, S, D = x.shape
    Dh = D // num_heads

    def ln(v, g, b):
        mu = v.mean(-1, keepdims=True)
        var = ((v - mu) ** 2).mean(-1, keepdims=True)
        return (v - mu) / jnp.sqrt(var + eps) * g + b

    bias = jnp.where(key_padding_mask, -1e30, 0.0).astype(jnp.float32)  # (B, S)

    xn = ln(x, params["ln1_g"], params["ln1_b"])
    q = xn @ params["wq"] + params["bq"]
    k = xn @ params["wk"] + params["bk"]
    v = xn @ params["wv"] + params["bv"]
    qh = q.reshape(B, S, num_heads, Dh)
    kh = k.reshape(B, S, num_heads, Dh)
    vh = v.reshape(B, S, num_heads, Dh)
    s = jnp.einsum("bqhd,bkhd->bhqk", qh, kh) / math.sqrt(Dh)
    s = s + bias[:, None, None, :]
    p = jax.nn.softmax(s, axis=-1)
    a = jnp.einsum("bhqk,bkhd->bqhd", p, vh).reshape(B, S, D)
    a = a @ params["wo"] + params["bo"]
    x = x + a

    xn2 = ln(x, params["ln2_g"], params["ln2_b"])
    h1 = xn2 @ params["w1"] + params["b1"]
    h1 = h1 * jax.nn.sigmoid(h1)
    ff = h1 @ params["w2"] + params["b2"]
    return x + ff


if __name__ == "__main__":
    # Small deterministic shapes consistent with the module.
    batch, seq_len = 2, 8
    embed_dim, num_heads, ff_dim = 32, 4, 64

    key = jax.random.PRNGKey(0)
    ks = jax.random.split(key, 20)

    def w(k, shape, scale=0.1):
        return jax.random.normal(k, shape, dtype=jnp.float32) * scale

    # "Natural" parameters in (in_dim, out_dim) layout; converting from a torch
    # state_dict (which stores (out, in) and a packed in_proj_weight) is a
    # transpose + split done once in the wrapper.
    nat = {
        "ln1_g": 1.0 + w(ks[0], (1, embed_dim)), "ln1_b": w(ks[1], (1, embed_dim)),
        "wq": w(ks[2], (embed_dim, embed_dim)),  "bq": w(ks[3], (1, embed_dim)),
        "wk": w(ks[4], (embed_dim, embed_dim)),  "bk": w(ks[5], (1, embed_dim)),
        "wv": w(ks[6], (embed_dim, embed_dim)),  "bv": w(ks[7], (1, embed_dim)),
        "wo": w(ks[8], (embed_dim, embed_dim)),  "bo": w(ks[9], (1, embed_dim)),
        "ln2_g": 1.0 + w(ks[10], (1, embed_dim)), "ln2_b": w(ks[11], (1, embed_dim)),
        "w1": w(ks[12], (embed_dim, ff_dim)),    "b1": w(ks[13], (1, ff_dim)),
        "w2": w(ks[14], (ff_dim, embed_dim)),    "b2": w(ks[15], (1, embed_dim)),
    }
    kparams = prepare_params(nat, num_heads=num_heads)

    x = jax.random.normal(ks[16], (batch, seq_len, embed_dim), dtype=jnp.float32)
    # PyTorch convention: True = padding position to ignore.
    key_padding_mask = jnp.zeros((batch, seq_len), dtype=jnp.bool_)
    key_padding_mask = key_padding_mask.at[1, -1].set(True)

    out = encoding_layer_forward(x, kparams, key_padding_mask, num_heads=num_heads)
    out = jax.block_until_ready(out)

    ref = _reference_forward(x, nat, key_padding_mask, num_heads=num_heads)
    assert out.shape == (batch, seq_len, embed_dim)
    max_err = float(jnp.max(jnp.abs(out - ref)))
    # bf16 MXU operands with f32 accumulation -> relaxed tolerance vs. the f32 reference.
    assert max_err < 3e-2, f"max abs err {max_err}"

    print("KERNEL_OK")
</pallas_src>

<mosaic_0001>
module attributes {stable_mosaic.version = 11 : i64} {
  func.func @_encoding_layer_kernel(%arg0: i32, %arg1: memref<2x8x32xf32, #tpu.memory_space<vmem>>, %arg2: memref<2x1x8xf32, #tpu.memory_space<vmem>>, %arg3: memref<9x32xf32, #tpu.memory_space<vmem>>, %arg4: memref<1x64xf32, #tpu.memory_space<vmem>>, %arg5: memref<32x96xbf16, #tpu.memory_space<vmem>>, %arg6: memref<32x32xbf16, #tpu.memory_space<vmem>>, %arg7: memref<32x64xbf16, #tpu.memory_space<vmem>>, %arg8: memref<64x32xbf16, #tpu.memory_space<vmem>>, %arg9: memref<2x8x32xf32, #tpu.memory_space<vmem>>, %arg10: memref<16x32xf32, #tpu.memory_space<vmem>>) attributes {dimension_semantics = [#tpu.dimension_semantics<parallel>], iteration_bounds = array<i64: 1>, scalar_prefetch = 0 : i64, scratch_operands = 1 : i64, tpu.core_type = #tpu.core_type<tc>, window_params = [{transform_indices = @transform_0, window_bounds = array<i64: 2, 8, 32>}, {transform_indices = @transform_1, window_bounds = array<i64: 2, 1, 8>}, {pipeline_mode = #tpu.pipeline_mode<synchronous>, transform_indices = @transform_2, window_bounds = array<i64: 9, 32>}, {pipeline_mode = #tpu.pipeline_mode<synchronous>, transform_indices = @transform_3, window_bounds = array<i64: 1, 64>}, {pipeline_mode = #tpu.pipeline_mode<synchronous>, transform_indices = @transform_4, window_bounds = array<i64: 32, 96>}, {pipeline_mode = #tpu.pipeline_mode<synchronous>, transform_indices = @transform_5, window_bounds = array<i64: 32, 32>}, {pipeline_mode = #tpu.pipeline_mode<synchronous>, transform_indices = @transform_6, window_bounds = array<i64: 32, 64>}, {pipeline_mode = #tpu.pipeline_mode<synchronous>, transform_indices = @transform_7, window_bounds = array<i64: 64, 32>}, {transform_indices = @transform_8, window_bounds = array<i64: 2, 8, 32>}]} {
    %c0 = arith.constant 0 : index
    %c0_0 = arith.constant 0 : index
    %c0_1 = arith.constant 0 : index
    %0 = vector.load %arg1[%c0, %c0_0, %c0_1] : memref<2x8x32xf32, #tpu.memory_space<vmem>>, vector<2x8x32xf32>
    %1 = vector.shape_cast %0 : vector<2x8x32xf32> to vector<16x32xf32>
    %c0_2 = arith.constant 0 : index
    %c0_3 = arith.constant 0 : index
    %2 = vector.load %arg3[%c0_2, %c0_3] : memref<9x32xf32, #tpu.memory_space<vmem>>, vector<9x32xf32>
    %3 = vector.extract_strided_slice %2 {offsets = [0, 0], sizes = [1, 32], strides = [1, 1]} : vector<9x32xf32> to vector<1x32xf32>
    %4 = vector.extract_strided_slice %2 {offsets = [1, 0], sizes = [1, 32], strides = [1, 1]} : vector<9x32xf32> to vector<1x32xf32>
    %5 = vector.extract_strided_slice %2 {offsets = [2, 0], sizes = [1, 32], strides = [1, 1]} : vector<9x32xf32> to vector<1x32xf32>
    %6 = vector.extract_strided_slice %2 {offsets = [3, 0], sizes = [1, 32], strides = [1, 1]} : vector<9x32xf32> to vector<1x32xf32>
    %7 = vector.extract_strided_slice %2 {offsets = [4, 0], sizes = [1, 32], strides = [1, 1]} : vector<9x32xf32> to vector<1x32xf32>
    %8 = vector.extract_strided_slice %2 {offsets = [5, 0], sizes = [1, 32], strides = [1, 1]} : vector<9x32xf32> to vector<1x32xf32>
    %9 = vector.extract_strided_slice %2 {offsets = [6, 0], sizes = [1, 32], strides = [1, 1]} : vector<9x32xf32> to vector<1x32xf32>
    %10 = vector.extract_strided_slice %2 {offsets = [7, 0], sizes = [1, 32], strides = [1, 1]} : vector<9x32xf32> to vector<1x32xf32>
    %11 = vector.extract_strided_slice %2 {offsets = [8, 0], sizes = [1, 32], strides = [1, 1]} : vector<9x32xf32> to vector<1x32xf32>
    %cst = arith.constant dense<0.000000e+00> : vector<16xf32>
    %12 = vector.multi_reduction <add>, %1, %cst [1] : vector<16x32xf32> to vector<16xf32>
    %13 = vector.shape_cast %12 : vector<16xf32> to vector<16x1xf32>
    %cst_4 = arith.constant 3.200000e+01 : f32
    %14 = vector.broadcast %cst_4 : f32 to vector<16x1xf32>
    %15 = arith.divf %13, %14 : vector<16x1xf32>
    %16 = vector.broadcast %15 : vector<16x1xf32> to vector<16x32xf32>
    %17 = arith.subf %1, %16 : vector<16x32xf32>
    %18 = arith.mulf %17, %17 : vector<16x32xf32>
    %cst_5 = arith.constant dense<0.000000e+00> : vector<16xf32>
    %19 = vector.multi_reduction <add>, %18, %cst_5 [1] : vector<16x32xf32> to vector<16xf32>
    %20 = vector.shape_cast %19 : vector<16xf32> to vector<16x1xf32>
    %cst_6 = arith.constant 3.200000e+01 : f32
    %21 = vector.broadcast %cst_6 : f32 to vector<16x1xf32>
    %22 = arith.divf %20, %21 : vector<16x1xf32>
    %cst_7 = arith.constant 9.99999974E-6 : f32
    %23 = vector.broadcast %cst_7 : f32 to vector<16x1xf32>
    %24 = arith.addf %22, %23 : vector<16x1xf32>
    %25 = math.rsqrt %24 : vector<16x1xf32>
    %26 = vector.broadcast %25 : vector<16x1xf32> to vector<16x32xf32>
    %27 = arith.mulf %17, %26 : vector<16x32xf32>
    %28 = vector.broadcast %3 : vector<1x32xf32> to vector<16x32xf32>
    %29 = arith.mulf %27, %28 : vector<16x32xf32>
    %30 = vector.broadcast %4 : vector<1x32xf32> to vector<16x32xf32>
    %31 = arith.addf %29, %30 : vector<16x32xf32>
    %32 = arith.truncf %31 : vector<16x32xf32> to vector<16x32xbf16>
    %c0_8 = arith.constant 0 : index
    %c0_9 = arith.constant 0 : index
    %33 = vector.load %arg5[%c0_8, %c0_9] : memref<32x96xbf16, #tpu.memory_space<vmem>>, vector<32x96xbf16>
    %cst_10 = arith.constant dense<0.000000e+00> : vector<16x96xf32>
    %34 = tpu.matmul %32, %33, %cst_10 {dimension_numbers = #tpu.dot_dimension_numbers<[1], [0], [0], [1], [0, 0, 1, 1], [], []>} : vector<16x32xbf16>, vector<32x96xbf16>, vector<16x96xf32> -> vector<16x96xf32>
    %35 = vector.extract_strided_slice %34 {offsets = [0, 0], sizes = [16, 32], strides = [1, 1]} : vector<16x96xf32> to vector<16x32xf32>
    %36 = vector.broadcast %9 : vector<1x32xf32> to vector<16x32xf32>
    %37 = arith.addf %35, %36 : vector<16x32xf32>
    %38 = arith.truncf %37 : vector<16x32xf32> to vector<16x32xbf16>
    %39 = vector.extract_strided_slice %34 {offsets = [0, 32], sizes = [16, 32], strides = [1, 1]} : vector<16x96xf32> to vector<16x32xf32>
    %40 = vector.broadcast %10 : vector<1x32xf32> to vector<16x32xf32>
    %41 = arith.addf %39, %40 : vector<16x32xf32>
    %42 = arith.truncf %41 : vector<16x32xf32> to vector<16x32xbf16>
    %43 = vector.extract_strided_slice %34 {offsets = [0, 64], sizes = [16, 32], strides = [1, 1]} : vector<16x96xf32> to vector<16x32xf32>
    %44 = vector.broadcast %11 : vector<1x32xf32> to vector<16x32xf32>
    %45 = arith.addf %43, %44 : vector<16x32xf32>
    %46 = arith.truncf %45 : vector<16x32xf32> to vector<16x32xbf16>
    %c0_11 = arith.constant 0 : index
    %c0_12 = arith.constant 0 : index
    %c0_13 = arith.constant 0 : index
    %47 = vector.load %arg2[%c0_11, %c0_12, %c0_13] : memref<2x1x8xf32, #tpu.memory_space<vmem>>, vector<2x1x8xf32>
    %48 = vector.extract_strided_slice %38 {offsets = [0, 0], sizes = [8, 32], strides = [1, 1]} : vector<16x32xbf16> to vector<8x32xbf16>
    %49 = vector.extract_strided_slice %42 {offsets = [0, 0], sizes = [8, 32], strides = [1, 1]} : vector<16x32xbf16> to vector<8x32xbf16>
    %50 = vector.extract_strided_slice %46 {offsets = [0, 0], sizes = [8, 32], strides = [1, 1]} : vector<16x32xbf16> to vector<8x32xbf16>
    %51 = vector.extract_strided_slice %47 {offsets = [0, 0, 0], sizes = [1, 1, 8], strides = [1, 1, 1]} : vector<2x1x8xf32> to vector<1x1x8xf32>
    %52 = vector.shape_cast %51 : vector<1x1x8xf32> to vector<1x8xf32>
    %53 = vector.extract_strided_slice %48 {offsets = [0, 0], sizes = [8, 8], strides = [1, 1]} : vector<8x32xbf16> to vector<8x8xbf16>
    %54 = vector.extract_strided_slice %49 {offsets = [0, 0], sizes = [8, 8], strides = [1, 1]} : vector<8x32xbf16> to vector<8x8xbf16>
    %cst_14 = arith.constant dense<0.000000e+00> : vector<8x8xf32>
    %55 = tpu.matmul %53, %54, %cst_14 {dimension_numbers = #tpu.dot_dimension_numbers<[1], [1], [0], [0], [0, 0, 1, 0], [], []>} : vector<8x8xbf16>, vector<8x8xbf16>, vector<8x8xf32> -> vector<8x8xf32>
    %56 = vector.broadcast %52 : vector<1x8xf32> to vector<8x8xf32>
    %57 = arith.addf %55, %56 : vector<8x8xf32>
    %cst_15 = arith.constant dense<0xFF800000> : vector<8xf32>
    %58 = vector.multi_reduction <maximumf>, %57, %cst_15 [1] : vector<8x8xf32> to vector<8xf32>
    %59 = vector.shape_cast %58 : vector<8xf32> to vector<8x1xf32>
    %60 = vector.broadcast %59 : vector<8x1xf32> to vector<8x8xf32>
    %61 = arith.subf %57, %60 : vector<8x8xf32>
    %62 = math.exp %61 : vector<8x8xf32>
    %cst_16 = arith.constant dense<0.000000e+00> : vector<8xf32>
    %63 = vector.multi_reduction <add>, %62, %cst_16 [1] : vector<8x8xf32> to vector<8xf32>
    %64 = vector.shape_cast %63 : vector<8xf32> to vector<8x1xf32>
    %65 = tpu.reciprocal %64 {approx = true} : vector<8x1xf32> -> vector<8x1xf32>
    %66 = vector.broadcast %65 : vector<8x1xf32> to vector<8x8xf32>
    %67 = arith.mulf %62, %66 : vector<8x8xf32>
    %68 = arith.truncf %67 : vector<8x8xf32> to vector<8x8xbf16>
    %69 = vector.extract_strided_slice %50 {offsets = [0, 0], sizes = [8, 8], strides = [1, 1]} : vector<8x32xbf16> to vector<8x8xbf16>
    %cst_17 = arith.constant dense<0.000000e+00> : vector<8x8xf32>
    %70 = tpu.matmul %68, %69, %cst_17 {dimension_numbers = #tpu.dot_dimension_numbers<[1], [0], [0], [1], [0, 0, 1, 1], [], []>} : vector<8x8xbf16>, vector<8x8xbf16>, vector<8x8xf32> -> vector<8x8xf32>
    %c0_18 = arith.constant 0 : index
    %c0_19 = arith.constant 0 : index
    %71 = vector.load %arg10[%c0_18, %c0_19] : memref<16x32xf32, #tpu.memory_space<vmem>>, vector<8x8xf32>
    tpu.vector_store %arg10[%c0_18, %c0_19], %70 {strides = array<i32>} : memref<16x32xf32, #tpu.memory_space<vmem>>, vector<8x8xf32>,
    %72 = vector.extract_strided_slice %48 {offsets = [0, 8], sizes = [8, 8], strides = [1, 1]} : vector<8x32xbf16> to vector<8x8xbf16>
    %73 = vector.extract_strided_slice %49 {offsets = [0, 8], sizes = [8, 8], strides = [1, 1]} : vector<8x32xbf16> to vector<8x8xbf16>
    %cst_20 = arith.constant dense<0.000000e+00> : vector<8x8xf32>
    %74 = tpu.matmul %72, %73, %cst_20 {dimension_numbers = #tpu.dot_dimension_numbers<[1], [1], [0], [0], [0, 0, 1, 0], [], []>} : vector<8x8xbf16>, vector<8x8xbf16>, vector<8x8xf32> -> vector<8x8xf32>
    %75 = vector.broadcast %52 : vector<1x8xf32> to vector<8x8xf32>
    %76 = arith.addf %74, %75 : vector<8x8xf32>
    %cst_21 = arith.constant dense<0xFF800000> : vector<8xf32>
    %77 = vector.multi_reduction <maximumf>, %76, %cst_21 [1] : vector<8x8xf32> to vector<8xf32>
    %78 = vector.shape_cast %77 : vector<8xf32> to vector<8x1xf32>
    %79 = vector.broadcast %78 : vector<8x1xf32> to vector<8x8xf32>
    %80 = arith.subf %76, %79 : vector<8x8xf32>
    %81 = math.exp %80 : vector<8x8xf32>
    %cst_22 = arith.constant dense<0.000000e+00> : vector<8xf32>
    %82 = vector.multi_reduction <add>, %81, %cst_22 [1] : vector<8x8xf32> to vector<8xf32>
    %83 = vector.shape_cast %82 : vector<8xf32> to vector<8x1xf32>
    %84 = tpu.reciprocal %83 {approx = true} : vector<8x1xf32> -> vector<8x1xf32>
    %85 = vector.broadcast %84 : vector<8x1xf32> to vector<8x8xf32>
    %86 = arith.mulf %81, %85 : vector<8x8xf32>
    %87 = arith.truncf %86 : vector<8x8xf32> to vector<8x8xbf16>
    %88 = vector.extract_strided_slice %50 {offsets = [0, 8], sizes = [8, 8], strides = [1, 1]} : vector<8x32xbf16> to vector<8x8xbf16>
    %cst_23 = arith.constant dense<0.000000e+00> : vector<8x8xf32>
    %89 = tpu.matmul %87, %88, %cst_23 {dimension_numbers = #tpu.dot_dimension_numbers<[1], [0], [0], [1], [0, 0, 1, 1], [], []>} : vector<8x8xbf16>, vector<8x8xbf16>, vector<8x8xf32> -> vector<8x8xf32>
    %c0_24 = arith.constant 0 : index
    %c8 = arith.constant 8 : index
    %90 = vector.load %arg10[%c0_24, %c8] : memref<16x32xf32, #tpu.memory_space<vmem>>, vector<8x8xf32>
    tpu.vector_store %arg10[%c0_24, %c8], %89 {strides = array<i32>} : memref<16x32xf32, #tpu.memory_space<vmem>>, vector<8x8xf32>,
    %91 = vector.extract_strided_slice %48 {offsets = [0, 16], sizes = [8, 8], strides = [1, 1]} : vector<8x32xbf16> to vector<8x8xbf16>
    %92 = vector.extract_strided_slice %49 {offsets = [0, 16], sizes = [8, 8], strides = [1, 1]} : vector<8x32xbf16> to vector<8x8xbf16>
    %cst_25 = arith.constant dense<0.000000e+00> : vector<8x8xf32>
    %93 = tpu.matmul %91, %92, %cst_25 {dimension_numbers = #tpu.dot_dimension_numbers<[1], [1], [0], [0], [0, 0, 1, 0], [], []>} : vector<8x8xbf16>, vector<8x8xbf16>, vector<8x8xf32> -> vector<8x8xf32>
    %94 = vector.broadcast %52 : vector<1x8xf32> to vector<8x8xf32>
    %95 = arith.addf %93, %94 : vector<8x8xf32>
    %cst_26 = arith.constant dense<0xFF800000> : vector<8xf32>
    %96 = vector.multi_reduction <maximumf>, %95, %cst_26 [1] : vector<8x8xf32> to vector<8xf32>
    %97 = vector.shape_cast %96 : vector<8xf32> to vector<8x1xf32>
    %98 = vector.broadcast %97 : vector<8x1xf32> to vector<8x8xf32>
    %99 = arith.subf %95, %98 : vector<8x8xf32>
    %100 = math.exp %99 : vector<8x8xf32>
    %cst_27 = arith.constant dense<0.000000e+00> : vector<8xf32>
    %101 = vector.multi_reduction <add>, %100, %cst_27 [1] : vector<8x8xf32> to vector<8xf32>
    %102 = vector.shape_cast %101 : vector<8xf32> to vector<8x1xf32>
    %103 = tpu.reciprocal %102 {approx = true} : vector<8x1xf32> -> vector<8x1xf32>
    %104 = vector.broadcast %103 : vector<8x1xf32> to vector<8x8xf32>
    %105 = arith.mulf %100, %104 : vector<8x8xf32>
    %106 = arith.truncf %105 : vector<8x8xf32> to vector<8x8xbf16>
    %107 = vector.extract_strided_slice %50 {offsets = [0, 16], sizes = [8, 8], strides = [1, 1]} : vector<8x32xbf16> to vector<8x8xbf16>
    %cst_28 = arith.constant dense<0.000000e+00> : vector<8x8xf32>
    %108 = tpu.matmul %106, %107, %cst_28 {dimension_numbers = #tpu.dot_dimension_numbers<[1], [0], [0], [1], [0, 0, 1, 1], [], []>} : vector<8x8xbf16>, vector<8x8xbf16>, vector<8x8xf32> -> vector<8x8xf32>
    %c0_29 = arith.constant 0 : index
    %c16 = arith.constant 16 : index
    %109 = vector.load %arg10[%c0_29, %c16] : memref<16x32xf32, #tpu.memory_space<vmem>>, vector<8x8xf32>
    tpu.vector_store %arg10[%c0_29, %c16], %108 {strides = array<i32>} : memref<16x32xf32, #tpu.memory_space<vmem>>, vector<8x8xf32>,
    %110 = vector.extract_strided_slice %48 {offsets = [0, 24], sizes = [8, 8], strides = [1, 1]} : vector<8x32xbf16> to vector<8x8xbf16>
    %111 = vector.extract_strided_slice %49 {offsets = [0, 24], sizes = [8, 8], strides = [1, 1]} : vector<8x32xbf16> to vector<8x8xbf16>
    %cst_30 = arith.constant dense<0.000000e+00> : vector<8x8xf32>
    %112 = tpu.matmul %110, %111, %cst_30 {dimension_numbers = #tpu.dot_dimension_numbers<[1], [1], [0], [0], [0, 0, 1, 0], [], []>} : vector<8x8xbf16>, vector<8x8xbf16>, vector<8x8xf32> -> vector<8x8xf32>
    %113 = vector.broadcast %52 : vector<1x8xf32> to vector<8x8xf32>
    %114 = arith.addf %112, %113 : vector<8x8xf32>
    %cst_31 = arith.constant dense<0xFF800000> : vector<8xf32>
    %115 = vector.multi_reduction <maximumf>, %114, %cst_31 [1] : vector<8x8xf32> to vector<8xf32>
    %116 = vector.shape_cast %115 : vector<8xf32> to vector<8x1xf32>
    %117 = vector.broadcast %116 : vector<8x1xf32> to vector<8x8xf32>
    %118 = arith.subf %114, %117 : vector<8x8xf32>
    %119 = math.exp %118 : vector<8x8xf32>
    %cst_32 = arith.constant dense<0.000000e+00> : vector<8xf32>
    %120 = vector.multi_reduction <add>, %119, %cst_32 [1] : vector<8x8xf32> to vector<8xf32>
    %121 = vector.shape_cast %120 : vector<8xf32> to vector<8x1xf32>
    %122 = tpu.reciprocal %121 {approx = true} : vector<8x1xf32> -> vector<8x1xf32>
    %123 = vector.broadcast %122 : vector<8x1xf32> to vector<8x8xf32>
    %124 = arith.mulf %119, %123 : vector<8x8xf32>
    %125 = arith.truncf %124 : vector<8x8xf32> to vector<8x8xbf16>
    %126 = vector.extract_strided_slice %50 {offsets = [0, 24], sizes = [8, 8], strides = [1, 1]} : vector<8x32xbf16> to vector<8x8xbf16>
    %cst_33 = arith.constant dense<0.000000e+00> : vector<8x8xf32>
    %127 = tpu.matmul %125, %126, %cst_33 {dimension_numbers = #tpu.dot_dimension_numbers<[1], [0], [0], [1], [0, 0, 1, 1], [], []>} : vector<8x8xbf16>, vector<8x8xbf16>, vector<8x8xf32> -> vector<8x8xf32>
    %c0_34 = arith.constant 0 : index
    %c24 = arith.constant 24 : index
    %128 = vector.load %arg10[%c0_34, %c24] : memref<16x32xf32, #tpu.memory_space<vmem>>, vector<8x8xf32>
    tpu.vector_store %arg10[%c0_34, %c24], %127 {strides = array<i32>} : memref<16x32xf32, #tpu.memory_space<vmem>>, vector<8x8xf32>,
    %129 = vector.extract_strided_slice %38 {offsets = [8, 0], sizes = [8, 32], strides = [1, 1]} : vector<16x32xbf16> to vector<8x32xbf16>
    %130 = vector.extract_strided_slice %42 {offsets = [8, 0], sizes = [8, 32], strides = [1, 1]} : vector<16x32xbf16> to vector<8x32xbf16>
    %131 = vector.extract_strided_slice %46 {offsets = [8, 0], sizes = [8, 32], strides = [1, 1]} : vector<16x32xbf16> to vector<8x32xbf16>
    %132 = vector.extract_strided_slice %47 {offsets = [1, 0, 0], sizes = [1, 1, 8], strides = [1, 1, 1]} : vector<2x1x8xf32> to vector<1x1x8xf32>
    %133 = vector.shape_cast %132 : vector<1x1x8xf32> to vector<1x8xf32>
    %134 = vector.extract_strided_slice %129 {offsets = [0, 0], sizes = [8, 8], strides = [1, 1]} : vector<8x32xbf16> to vector<8x8xbf16>
    %135 = vector.extract_strided_slice %130 {offsets = [0, 0], sizes = [8, 8], strides = [1, 1]} : vector<8x32xbf16> to vector<8x8xbf16>
    %cst_35 = arith.constant dense<0.000000e+00> : vector<8x8xf32>
    %136 = tpu.matmul %134, %135, %cst_35 {dimension_numbers = #tpu.dot_dimension_numbers<[1], [1], [0], [0], [0, 0, 1, 0], [], []>} : vector<8x8xbf16>, vector<8x8xbf16>, vector<8x8xf32> -> vector<8x8xf32>
    %137 = vector.broadcast %133 : vector<1x8xf32> to vector<8x8xf32>
    %138 = arith.addf %136, %137 : vector<8x8xf32>
    %cst_36 = arith.constant dense<0xFF800000> : vector<8xf32>
    %139 = vector.multi_reduction <maximumf>, %138, %cst_36 [1] : vector<8x8xf32> to vector<8xf32>
    %140 = vector.shape_cast %139 : vector<8xf32> to vector<8x1xf32>
    %141 = vector.broadcast %140 : vector<8x1xf32> to vector<8x8xf32>
    %142 = arith.subf %138, %141 : vector<8x8xf32>
    %143 = math.exp %142 : vector<8x8xf32>
    %cst_37 = arith.constant dense<0.000000e+00> : vector<8xf32>
    %144 = vector.multi_reduction <add>, %143, %cst_37 [1] : vector<8x8xf32> to vector<8xf32>
    %145 = vector.shape_cast %144 : vector<8xf32> to vector<8x1xf32>
    %146 = tpu.reciprocal %145 {approx = true} : vector<8x1xf32> -> vector<8x1xf32>
    %147 = vector.broadcast %146 : vector<8x1xf32> to vector<8x8xf32>
    %148 = arith.mulf %143, %147 : vector<8x8xf32>
    %149 = arith.truncf %148 : vector<8x8xf32> to vector<8x8xbf16>
    %150 = vector.extract_strided_slice %131 {offsets = [0, 0], sizes = [8, 8], strides = [1, 1]} : vector<8x32xbf16> to vector<8x8xbf16>
    %cst_38 = arith.constant dense<0.000000e+00> : vector<8x8xf32>
    %151 = tpu.matmul %149, %150, %cst_38 {dimension_numbers = #tpu.dot_dimension_numbers<[1], [0], [0], [1], [0, 0, 1, 1], [], []>} : vector<8x8xbf16>, vector<8x8xbf16>, vector<8x8xf32> -> vector<8x8xf32>
    %c8_39 = arith.constant 8 : index
    %c0_40 = arith.constant 0 : index
    %152 = vector.load %arg10[%c8_39, %c0_40] : memref<16x32xf32, #tpu.memory_space<vmem>>, vector<8x8xf32>
    tpu.vector_store %arg10[%c8_39, %c0_40], %151 {strides = array<i32>} : memref<16x32xf32, #tpu.memory_space<vmem>>, vector<8x8xf32>,
    %153 = vector.extract_strided_slice %129 {offsets = [0, 8], sizes = [8, 8], strides = [1, 1]} : vector<8x32xbf16> to vector<8x8xbf16>
    %154 = vector.extract_strided_slice %130 {offsets = [0, 8], sizes = [8, 8], strides = [1, 1]} : vector<8x32xbf16> to vector<8x8xbf16>
    %cst_41 = arith.constant dense<0.000000e+00> : vector<8x8xf32>
    %155 = tpu.matmul %153, %154, %cst_41 {dimension_numbers = #tpu.dot_dimension_numbers<[1], [1], [0], [0], [0, 0, 1, 0], [], []>} : vector<8x8xbf16>, vector<8x8xbf16>, vector<8x8xf32> -> vector<8x8xf32>
    %156 = vector.broadcast %133 : vector<1x8xf32> to vector<8x8xf32>
    %157 = arith.addf %155, %156 : vector<8x8xf32>
    %cst_42 = arith.constant dense<0xFF800000> : vector<8xf32>
    %158 = vector.multi_reduction <maximumf>, %157, %cst_42 [1] : vector<8x8xf32> to vector<8xf32>
    %159 = vector.shape_cast %158 : vector<8xf32> to vector<8x1xf32>
    %160 = vector.broadcast %159 : vector<8x1xf32> to vector<8x8xf32>
    %161 = arith.subf %157, %160 : vector<8x8xf32>
    %162 = math.exp %161 : vector<8x8xf32>
    %cst_43 = arith.constant dense<0.000000e+00> : vector<8xf32>
    %163 = vector.multi_reduction <add>, %162, %cst_43 [1] : vector<8x8xf32> to vector<8xf32>
    %164 = vector.shape_cast %163 : vector<8xf32> to vector<8x1xf32>
    %165 = tpu.reciprocal %164 {approx = true} : vector<8x1xf32> -> vector<8x1xf32>
    %166 = vector.broadcast %165 : vector<8x1xf32> to vector<8x8xf32>
    %167 = arith.mulf %162, %166 : vector<8x8xf32>
    %168 = arith.truncf %167 : vector<8x8xf32> to vector<8x8xbf16>
    %169 = vector.extract_strided_slice %131 {offsets = [0, 8], sizes = [8, 8], strides = [1, 1]} : vector<8x32xbf16> to vector<8x8xbf16>
    %cst_44 = arith.constant dense<0.000000e+00> : vector<8x8xf32>
    %170 = tpu.matmul %168, %169, %cst_44 {dimension_numbers = #tpu.dot_dimension_numbers<[1], [0], [0], [1], [0, 0, 1, 1], [], []>} : vector<8x8xbf16>, vector<8x8xbf16>, vector<8x8xf32> -> vector<8x8xf32>
    %c8_45 = arith.constant 8 : index
    %c8_46 = arith.constant 8 : index
    %171 = vector.load %arg10[%c8_45, %c8_46] : memref<16x32xf32, #tpu.memory_space<vmem>>, vector<8x8xf32>
    tpu.vector_store %arg10[%c8_45, %c8_46], %170 {strides = array<i32>} : memref<16x32xf32, #tpu.memory_space<vmem>>, vector<8x8xf32>,
    %172 = vector.extract_strided_slice %129 {offsets = [0, 16], sizes = [8, 8], strides = [1, 1]} : vector<8x32xbf16> to vector<8x8xbf16>
    %173 = vector.extract_strided_slice %130 {offsets = [0, 16], sizes = [8, 8], strides = [1, 1]} : vector<8x32xbf16> to vector<8x8xbf16>
    %cst_47 = arith.constant dense<0.000000e+00> : vector<8x8xf32>
    %174 = tpu.matmul %172, %173, %cst_47 {dimension_numbers = #tpu.dot_dimension_numbers<[1], [1], [0], [0], [0, 0, 1, 0], [], []>} : vector<8x8xbf16>, vector<8x8xbf16>, vector<8x8xf32> -> vector<8x8xf32>
    %175 = vector.broadcast %133 : vector<1x8xf32> to vector<8x8xf32>
    %176 = arith.addf %174, %175 : vector<8x8xf32>
    %cst_48 = arith.constant dense<0xFF800000> : vector<8xf32>
    %177 = vector.multi_reduction <maximumf>, %176, %cst_48 [1] : vector<8x8xf32> to vector<8xf32>
    %178 = vector.shape_cast %177 : vector<8xf32> to vector<8x1xf32>
    %179 = vector.broadcast %178 : vector<8x1xf32> to vector<8x8xf32>
    %180 = arith.subf %176, %179 : vector<8x8xf32>
    %181 = math.exp %180 : vector<8x8xf32>
    %cst_49 = arith.constant dense<0.000000e+00> : vector<8xf32>
    %182 = vector.multi_reduction <add>, %181, %cst_49 [1] : vector<8x8xf32> to vector<8xf32>
    %183 = vector.shape_cast %182 : vector<8xf32> to vector<8x1xf32>
    %184 = tpu.reciprocal %183 {approx = true} : vector<8x1xf32> -> vector<8x1xf32>
    %185 = vector.broadcast %184 : vector<8x1xf32> to vector<8x8xf32>
    %186 = arith.mulf %181, %185 : vector<8x8xf32>
    %187 = arith.truncf %186 : vector<8x8xf32> to vector<8x8xbf16>
    %188 = vector.extract_strided_slice %131 {offsets = [0, 16], sizes = [8, 8], strides = [1, 1]} : vector<8x32xbf16> to vector<8x8xbf16>
    %cst_50 = arith.constant dense<0.000000e+00> : vector<8x8xf32>
    %189 = tpu.matmul %187, %188, %cst_50 {dimension_numbers = #tpu.dot_dimension_numbers<[1], [0], [0], [1], [0, 0, 1, 1], [], []>} : vector<8x8xbf16>, vector<8x8xbf16>, vector<8x8xf32> -> vector<8x8xf32>
    %c8_51 = arith.constant 8 : index
    %c16_52 = arith.constant 16 : index
    %190 = vector.load %arg10[%c8_51, %c16_52] : memref<16x32xf32, #tpu.memory_space<vmem>>, vector<8x8xf32>
    tpu.vector_store %arg10[%c8_51, %c16_52], %189 {strides = array<i32>} : memref<16x32xf32, #tpu.memory_space<vmem>>, vector<8x8xf32>,
    %191 = vector.extract_strided_slice %129 {offsets = [0, 24], sizes = [8, 8], strides = [1, 1]} : vector<8x32xbf16> to vector<8x8xbf16>
    %192 = vector.extract_strided_slice %130 {offsets = [0, 24], sizes = [8, 8], strides = [1, 1]} : vector<8x32xbf16> to vector<8x8xbf16>
    %cst_53 = arith.constant dense<0.000000e+00> : vector<8x8xf32>
    %193 = tpu.matmul %191, %192, %cst_53 {dimension_numbers = #tpu.dot_dimension_numbers<[1], [1], [0], [0], [0, 0, 1, 0], [], []>} : vector<8x8xbf16>, vector<8x8xbf16>, vector<8x8xf32> -> vector<8x8xf32>
    %194 = vector.broadcast %133 : vector<1x8xf32> to vector<8x8xf32>
    %195 = arith.addf %193, %194 : vector<8x8xf32>
    %cst_54 = arith.constant dense<0xFF800000> : vector<8xf32>
    %196 = vector.multi_reduction <maximumf>, %195, %cst_54 [1] : vector<8x8xf32> to vector<8xf32>
    %197 = vector.shape_cast %196 : vector<8xf32> to vector<8x1xf32>
    %198 = vector.broadcast %197 : vector<8x1xf32> to vector<8x8xf32>
    %199 = arith.subf %195, %198 : vector<8x8xf32>
    %200 = math.exp %199 : vector<8x8xf32>
    %cst_55 = arith.constant dense<0.000000e+00> : vector<8xf32>
    %201 = vector.multi_reduction <add>, %200, %cst_55 [1] : vector<8x8xf32> to vector<8xf32>
    %202 = vector.shape_cast %201 : vector<8xf32> to vector<8x1xf32>
    %203 = tpu.reciprocal %202 {approx = true} : vector<8x1xf32> -> vector<8x1xf32>
    %204 = vector.broadcast %203 : vector<8x1xf32> to vector<8x8xf32>
    %205 = arith.mulf %200, %204 : vector<8x8xf32>
    %206 = arith.truncf %205 : vector<8x8xf32> to vector<8x8xbf16>
    %207 = vector.extract_strided_slice %131 {offsets = [0, 24], sizes = [8, 8], strides = [1, 1]} : vector<8x32xbf16> to vector<8x8xbf16>
    %cst_56 = arith.constant dense<0.000000e+00> : vector<8x8xf32>
    %208 = tpu.matmul %206, %207, %cst_56 {dimension_numbers = #tpu.dot_dimension_numbers<[1], [0], [0], [1], [0, 0, 1, 1], [], []>} : vector<8x8xbf16>, vector<8x8xbf16>, vector<8x8xf32> -> vector<8x8xf32>
    %c8_57 = arith.constant 8 : index
    %c24_58 = arith.constant 24 : index
    %209 = vector.load %arg10[%c8_57, %c24_58] : memref<16x32xf32, #tpu.memory_space<vmem>>, vector<8x8xf32>
    tpu.vector_store %arg10[%c8_57, %c24_58], %208 {strides = array<i32>} : memref<16x32xf32, #tpu.memory_space<vmem>>, vector<8x8xf32>,
    %c0_59 = arith.constant 0 : index
    %c0_60 = arith.constant 0 : index
    %210 = vector.load %arg10[%c0_59, %c0_60] : memref<16x32xf32, #tpu.memory_space<vmem>>, vector<16x32xf32>
    %211 = arith.truncf %210 : vector<16x32xf32> to vector<16x32xbf16>
    %c0_61 = arith.constant 0 : index
    %c0_62 = arith.constant 0 : index
    %212 = vector.load %arg6[%c0_61, %c0_62] : memref<32x32xbf16, #tpu.memory_space<vmem>>, vector<32x32xbf16>
    %cst_63 = arith.constant dense<0.000000e+00> : vector<16x32xf32>
    %213 = tpu.matmul %211, %212, %cst_63 {dimension_numbers = #tpu.dot_dimension_numbers<[1], [0], [0], [1], [0, 0, 1, 1], [], []>} : vector<16x32xbf16>, vector<32x32xbf16>, vector<16x32xf32> -> vector<16x32xf32>
    %214 = vector.broadcast %7 : vector<1x32xf32> to vector<16x32xf32>
    %215 = arith.addf %213, %214 : vector<16x32xf32>
    %216 = arith.addf %1, %215 : vector<16x32xf32>
    %cst_64 = arith.constant dense<0.000000e+00> : vector<16xf32>
    %217 = vector.multi_reduction <add>, %216, %cst_64 [1] : vector<16x32xf32> to vector<16xf32>
    %218 = vector.shape_cast %217 : vector<16xf32> to vector<16x1xf32>
    %cst_65 = arith.constant 3.200000e+01 : f32
    %219 = vector.broadcast %cst_65 : f32 to vector<16x1xf32>
    %220 = arith.divf %218, %219 : vector<16x1xf32>
    %221 = vector.broadcast %220 : vector<16x1xf32> to vector<16x32xf32>
    %222 = arith.subf %216, %221 : vector<16x32xf32>
    %223 = arith.mulf %222, %222 : vector<16x32xf32>
    %cst_66 = arith.constant dense<0.000000e+00> : vector<16xf32>
    %224 = vector.multi_reduction <add>, %223, %cst_66 [1] : vector<16x32xf32> to vector<16xf32>
    %225 = vector.shape_cast %224 : vector<16xf32> to vector<16x1xf32>
    %cst_67 = arith.constant 3.200000e+01 : f32
    %226 = vector.broadcast %cst_67 : f32 to vector<16x1xf32>
    %227 = arith.divf %225, %226 : vector<16x1xf32>
    %cst_68 = arith.constant 9.99999974E-6 : f32
    %228 = vector.broadcast %cst_68 : f32 to vector<16x1xf32>
    %229 = arith.addf %227, %228 : vector<16x1xf32>
    %230 = math.rsqrt %229 : vector<16x1xf32>
    %231 = vector.broadcast %230 : vector<16x1xf32> to vector<16x32xf32>
    %232 = arith.mulf %222, %231 : vector<16x32xf32>
    %233 = vector.broadcast %5 : vector<1x32xf32> to vector<16x32xf32>
    %234 = arith.mulf %232, %233 : vector<16x32xf32>
    %235 = vector.broadcast %6 : vector<1x32xf32> to vector<16x32xf32>
    %236 = arith.addf %234, %235 : vector<16x32xf32>
    %237 = arith.truncf %236 : vector<16x32xf32> to vector<16x32xbf16>
    %c0_69 = arith.constant 0 : index
    %c0_70 = arith.constant 0 : index
    %238 = vector.load %arg7[%c0_69, %c0_70] : memref<32x64xbf16, #tpu.memory_space<vmem>>, vector<32x64xbf16>
    %cst_71 = arith.constant dense<0.000000e+00> : vector<16x64xf32>
    %239 = tpu.matmul %237, %238, %cst_71 {dimension_numbers = #tpu.dot_dimension_numbers<[1], [0], [0], [1], [0, 0, 1, 1], [], []>} : vector<16x32xbf16>, vector<32x64xbf16>, vector<16x64xf32> -> vector<16x64xf32>
    %c0_72 = arith.constant 0 : index
    %c0_73 = arith.constant 0 : index
    %240 = vector.load %arg4[%c0_72, %c0_73] : memref<1x64xf32, #tpu.memory_space<vmem>>, vector<1x64xf32>
    %241 = vector.broadcast %240 : vector<1x64xf32> to vector<16x64xf32>
    %242 = arith.addf %239, %241 : vector<16x64xf32>
    %cst_74 = arith.constant 0.000000e+00 : f32
    %243 = vector.broadcast %cst_74 : f32 to vector<16x64xf32>
    %244 = arith.subf %243, %242 : vector<16x64xf32>
    %245 = math.exp %244 : vector<16x64xf32>
    %cst_75 = arith.constant 1.000000e+00 : f32
    %246 = vector.broadcast %cst_75 : f32 to vector<16x64xf32>
    %247 = arith.addf %246, %245 : vector<16x64xf32>
    %248 = tpu.reciprocal %247 {approx = true} : vector<16x64xf32> -> vector<16x64xf32>
    %249 = arith.mulf %242, %248 : vector<16x64xf32>
    %250 = arith.truncf %249 : vector<16x64xf32> to vector<16x64xbf16>
    %c0_76 = arith.constant 0 : index
    %c0_77 = arith.constant 0 : index
    %251 = vector.load %arg8[%c0_76, %c0_77] : memref<64x32xbf16, #tpu.memory_space<vmem>>, vector<64x32xbf16>
    %cst_78 = arith.constant dense<0.000000e+00> : vector<16x32xf32>
    %252 = tpu.matmul %250, %251, %cst_78 {dimension_numbers = #tpu.dot_dimension_numbers<[1], [0], [0], [1], [0, 0, 1, 1], [], []>} : vector<16x64xbf16>, vector<64x32xbf16>, vector<16x32xf32> -> vector<16x32xf32>
    %253 = vector.broadcast %8 : vector<1x32xf32> to vector<16x32xf32>
    %254 = arith.addf %252, %253 : vector<16x32xf32>
    %255 = arith.addf %216, %254 : vector<16x32xf32>
    %256 = vector.shape_cast %255 : vector<16x32xf32> to vector<2x8x32xf32>
    %c0_79 = arith.constant 0 : index
    %c0_80 = arith.constant 0 : index
    %c0_81 = arith.constant 0 : index
    %257 = vector.load %arg9[%c0_79, %c0_80, %c0_81] : memref<2x8x32xf32, #tpu.memory_space<vmem>>, vector<2x8x32xf32>
    tpu.vector_store %arg9[%c0_79, %c0_80, %c0_81], %256 {strides = array<i32>} : memref<2x8x32xf32, #tpu.memory_space<vmem>>, vector<2x8x32xf32>,
    return
  }
  func.func @transform_0(%arg0: i32) -> (i32, i32, i32) {
    %c0_i32 = arith.constant 0 : i32
    %c0_i32_0 = arith.constant 0 : i32
    %c0_i32_1 = arith.constant 0 : i32
    return %arg0, %c0_i32, %c0_i32_0 : i32, i32, i32
  }
  func.func @transform_1(%arg0: i32) -> (i32, i32, i32) {
    %c0_i32 = arith.constant 0 : i32
    %c0_i32_0 = arith.constant 0 : i32
    %c0_i32_1 = arith.constant 0 : i32
    return %arg0, %c0_i32, %c0_i32_0 : i32, i32, i32
  }
  func.func @transform_2(%arg0: i32) -> (i32, i32) {
    %c0_i32 = arith.constant 0 : i32
    %c0_i32_0 = arith.constant 0 : i32
    %c0_i32_1 = arith.constant 0 : i32
    return %c0_i32, %c0_i32_0 : i32, i32
  }
  func.func @transform_3(%arg0: i32) -> (i32, i32) {
    %c0_i32 = arith.constant 0 : i32
    %c0_i32_0 = arith.constant 0 : i32
    %c0_i32_1 = arith.constant 0 : i32
    return %c0_i32, %c0_i32_0 : i32, i32
  }
  func.func @transform_4(%arg0: i32) -> (i32, i32) {
    %c0_i32 = arith.constant 0 : i32
    %c0_i32_0 = arith.constant 0 : i32
    %c0_i32_1 = arith.constant 0 : i32
    return %c0_i32, %c0_i32_0 : i32, i32
  }
  func.func @transform_5(%arg0: i32) -> (i32, i32) {
    %c0_i32 = arith.constant 0 : i32
    %c0_i32_0 = arith.constant 0 : i32
    %c0_i32_1 = arith.constant 0 : i32
    return %c0_i32, %c0_i32_0 : i32, i32
  }
  func.func @transform_6(%arg0: i32) -> (i32, i32) {
    %c0_i32 = arith.constant 0 : i32
    %c0_i32_0 = arith.constant 0 : i32
    %c0_i32_1 = arith.constant 0 : i32
    return %c0_i32, %c0_i32_0 : i32, i32
  }
  func.func @transform_7(%arg0: i32) -> (i32, i32) {
    %c0_i32 = arith.constant 0 : i32
    %c0_i32_0 = arith.constant 0 : i32
    %c0_i32_1 = arith.constant 0 : i32
    return %c0_i32, %c0_i32_0 : i32, i32
  }
  func.func @transform_8(%arg0: i32) -> (i32, i32, i32) {
    %c0_i32 = arith.constant 0 : i32
    %c0_i32_0 = arith.constant 0 : i32
    %c0_i32_1 = arith.constant 0 : i32
    return %arg0, %c0_i32, %c0_i32_0 : i32, i32, i32
  }
}

</mosaic_0001>

<bundles_post_ra>
// kernel: tpu_custom_call.1
= control target key start
LH: loop header
LB: loop body
LE: loop exit
PB: predicated region body
PF: predicated region fallthrough
CT: control target
= control target key end

     0   :  { %13 = vsyncpa [#allocation4], 0  ;;  %s1464_s0 = inlined_call_operand.vmem [shape: f32[2,8,32], index: 0, kind: input, shape index: {}]   ;;  %s1465_s1 = inlined_call_operand.hbm [shape: f32[2,1,8], index: 1, kind: input, shape index: {}]   ;;  %s1466_s2 = inlined_call_operand.vmem [shape: f32[9,32], index: 2, kind: input, shape index: {}]   ;;  %s1467_s3 = inlined_call_operand.vmem [shape: f32[1,64], index: 3, kind: input, shape index: {}]   ;;  %s1468_s4 = inlined_call_operand.vmem [shape: bf16[32,96], index: 4, kind: input, shape index: {}]   ;;  %s1469_s5 = inlined_call_operand.hbm [shape: bf16[32,32], index: 5, kind: input, shape index: {}]   ;;  %s1470_s6 = inlined_call_operand.hbm [shape: bf16[32,64], index: 6, kind: input, shape index: {}]   ;;  %s1471_s7 = inlined_call_operand.vmem [shape: bf16[64,32], index: 7, kind: input, shape index: {}]   ;;  %s1472_s8 = inlined_call_operand.hbm [shape: f32[2,8,32], index: 8, kind: output, shape index: {}]  }
   0x1   :  { %14 = vsyncpa [#allocation7], 0  ;;  %s41_s29 = sshll.u32 %s1469_s5, 4  ;;  %s42_s29 = int_to_ptr.hbm [resolvable:$true] %s41_s29 }
   0x2   :  { %15 = vsyncpa [#allocation5], 0  ;;  %s1168_s30 = smov [#allocation6]   ;;  %s22_s12 = sshll.u32 %s1465_s1, 4  ;;  %s23_s12 = int_to_ptr.hbm [resolvable:$true] %s22_s12 }
   0x3   :  { %s43_s9 = sshll.u32 %s1168_s30, 4  ;;  %s1169_s13 = smov 64   ;;  %s44_s9 = int_to_ptr.vmem [resolvable:$true] %s43_s9 }
   0x4   :  { %s1170_s14 = smov 4   ;;  %s1171_s15 = smov [#allocation3]  }
   0x5   :  { %49 = dma.hbm_to_vmem [thread:$0]  %s42_s29, 256, %s44_s9, [#allocation7], %s1169_s13, %s1169_s13, %s1170_s14  }
   0x6   :  { %s24_s16 = sshll.u32 %s1171_s15, 4  ;;  %s1172_s17 = smov 16   ;;  %s25_s16 = int_to_ptr.vmem [resolvable:$true] %s24_s16 }
   0x7   :  { %s1173_s5 = smov 1   ;;  %s54_s20 = sshll.u32 %s1470_s6, 4  ;;  %s55_s20 = int_to_ptr.hbm [resolvable:$true] %s54_s20 }
   0x8   :  { %30 = dma.hbm_to_vmem [thread:$0]  %s23_s12, 32, %s25_s16, [#allocation4], %s1172_s17, %s1172_s17, %s1173_s5  }
   0x9   :  { %s1174_s1 = smov [#allocation8]  }
   0xa   :  { %s56_s21 = sshll.u32 %s1174_s1, 4  ;;  %s57_s21 = int_to_ptr.vmem [resolvable:$true] %s56_s21 }
   0xb   :  { %62 = dma.hbm_to_vmem [thread:$0]  %s55_s20, 256, %s57_s21, [#allocation7], %s1169_s13, %s1169_s13, %s1170_s14  }
   0xc   :  { %1162 = dma.done.wait [#allocation4], 32  }
   0xd   :  { %1163 = vsyncadd [#allocation4], 4294967264 }
   0xe   :  { %1164 = dma.done.wait [#allocation7], 512  }
   0xf   :  { %1165 = vsyncadd [#allocation7], 4294966784  ;;  %vm82_vm0 = vcmask 261120   ;;  %v1254_v0 = vld [vmem:[%s1464_s0] sm:$0xff]  ;;  %v1261_v2 = vld [vmem:[%s1464_s0 + $0x8] sm:$0xff]  ;;  %v1175_v4 = vmov 32.0  }
  0x10   :  { %v83_v1 = vsel %vm82_vm0, %v1254_v0, 0.0  ;;  %v86_v3 = vsel %vm82_vm0, %v1261_v2, 0.0  ;;  %1016 = vrcp.f32 %v1175_v4  ;;  %v980_v21 = vld [vmem:[%s1468_s4 + $0x8] sm:$0xff]  ;;  %v979_v23 = vld [vmem:[%s1468_s4] sm:$0xff]  ;;  %s1176_s30 = smov 32   ;;  %s1177_s4 = smov 88  }
  0x11   :  { %84 = vadd.xlane.f32.xlu0 %v83_v1  ;;  %166 = vmatpush.bf16.msra.mxu0 %v980_v21  ;;  %v1283_v26 = vld [vmem:[%s1466_s2] sm:$0xff]  ;;  %s1178_s9 = smov 96   ;;  %s1179_s10 = smov 120   ;;  %vm207_vm8 = vcmask 64512   ;;  %vm247_vm9 = vcmask 1043456   ;;  %vm328_vm10 = vcmask 130112  }
  0x12   :  { %v179_v27 = vperm.slane %v1283_v26, 7  ;;  %v134_v44 = vperm.slane %v1283_v26, 0  ;;  %v137_v49 = vperm.slane %v1283_v26, 1  ;;  %v174_v54 = vperm.slane %v1283_v26, 6  ;;  %s1180_s11 = smov 72   ;;  %s1181_s12 = smov 104  }
  0x13   :  { %s1182_s14 = smov 80   ;;  %s1183_s5 = smov 112   ;;  %vm390_vm11 = vcmask 195712   ;;  %vm452_vm12 = vcmask 261312  }
  0x14   :  { %181 = vrot.lane.b32.xlu2 %v179_v27, %s1176_s30  ;;  %s1185_s18 = smov 48   ;;  %s1186_s19 = smov 40  }
  0x15   :  { %167 = vmatpush.bf16.msra.mxu0 %v979_v23  ;;  %s1188_s20 = smov 24   ;;  %s905_s29 = sshll.u32 %s1472_s8, 4  ;;  %s906_s29 = int_to_ptr.hbm [resolvable:$true] %s905_s29 }
  0x16   :  { %v1017_v5 = vpop.eup %1016  ;;  %s1190_s30 = smov 128  }
  0x17   :  { %v90_v6 = vmul.f32 32.0, %v1017_v5  ;;  %vm94_vm1 = vweird.f32 %v1017_v5 }
  0x19   :  { %87 = vadd.xlane.f32.xlu0 %v86_v3  ;;  %v91_v7 = vsub.f32 1.0, %v90_v6 }
  0x1b   :  { %v92_v8 = vmul.f32 %v1017_v5, %v91_v7 }
  0x1d   :  { %v93_v9 = vadd.f32 %v1017_v5, %v92_v8 }
  0x1f   :  { %v1265_v10 = vsel %vm94_vm1, %v1017_v5, %v93_v9 }
  0x6e   :  { %v182_v55 = vpop.permute.xlu2 %181 }
  0x84   :  { %v85_v11 = vpop.xlane.xlu0 %84 }
  0x85   :  { %v96_v12 = vmul.f32 %v1265_v10, %v85_v11 }
  0x87   :  { %v98_v13 = vsub.f32 %v1254_v0, %v96_v12 }
  0x89   :  { %v100_v14 = vmul.f32 %v98_v13, %v98_v13 }
  0x8b   :  { %v102_v15 = vsel %vm82_vm0, %v100_v14, 0.0 }
  0x8c   :  { %103 = vadd.xlane.f32.xlu1 %v102_v15  ;;  %v88_v16 = vpop.xlane.xlu0 %87 }
  0x8d   :  { %v97_v17 = vmul.f32 %v1265_v10, %v88_v16 }
  0x8f   :  { %v99_v18 = vsub.f32 %v1261_v2, %v97_v17 }
  0x91   :  { %v101_v19 = vmul.f32 %v99_v18, %v99_v18 }
  0x93   :  { %v105_v20 = vsel %vm82_vm0, %v101_v19, 0.0 }
  0x94   :  { %106 = vadd.xlane.f32.xlu1 %v105_v20 }
  0xff   :  { %v104_v22 = vpop.xlane.xlu1 %103 }
 0x100   :  { %v108_v24 = vmul.f32 %v104_v22, %v1265_v10 }
 0x102   :  { %v110_v25 = vadd.f32 1e-05, %v108_v24 }
 0x104   :  { %1018 = vrsqrt.f32 %v110_v25  ;;  %vm118_vm3 = vweird.f32 %v110_v25 }
 0x107   :  { %v107_v28 = vpop.xlane.xlu1 %106 }
 0x108   :  { %v109_v29 = vmul.f32 %v107_v28, %v1265_v10 }
 0x10a   :  { %v1019_v30 = vpop.eup %1018  ;;  %v111_v31 = vadd.f32 1e-05, %v109_v29 }
 0x10b   :  { %v113_v32 = vmul.f32 %v1019_v30, %v110_v25  ;;  %vm119_vm2 = vweird.f32 %v1019_v30 }
 0x10c   :  { %1020 = vrsqrt.f32 %v111_v31  ;;  %vm120_vm4 = vmor %vm118_vm3, %vm119_vm2  ;;  %vm128_vm6 = vweird.f32 %v111_v31 }
 0x10d   :  { %v114_v33 = vmul.f32 %v1019_v30, %v113_v32 }
 0x10f   :  { %v115_v34 = vmul.f32 0.5, %v114_v33 }
 0x111   :  { %v116_v35 = vsub.f32 1.5, %v115_v34 }
 0x112   :  { %v1021_v36 = vpop.eup %1020 }
 0x113   :  { %v117_v37 = vmul.f32 %v1019_v30, %v116_v35  ;;  %v123_v38 = vmul.f32 %v1021_v36, %v111_v31  ;;  %vm129_vm5 = vweird.f32 %v1021_v36 }
 0x114   :  { %vm130_vm7 = vmor %vm128_vm6, %vm129_vm5 }
 0x115   :  { %v124_v39 = vmul.f32 %v1021_v36, %v123_v38  ;;  %v121_v40 = vsel %vm120_vm4, %v1019_v30, %v117_v37  ;;  %vm877_vm4 = vcmask 523264  }
 0x116   :  { %v132_v43 = vmul.f32 %v121_v40, %v98_v13  ;;  %v1012_v13 = vld [vmem:[%s1466_s2 + $0x8] ss:$0 sm:$0xff]  ;;  %s1184_s2 = smov 56  }
 0x117   :  { %v125_v41 = vmul.f32 0.5, %v124_v39 }
 0x118   :  { %v135_v48 = vmul.f32 %v134_v44, %v132_v43 }
 0x119   :  { %v126_v42 = vsub.f32 1.5, %v125_v41 }
 0x11a   :  { %v138_v51 = vadd.f32 %v137_v49, %v135_v48 }
 0x11b   :  { %v127_v45 = vmul.f32 %v1021_v36, %v126_v42  ;;  %v1013_v42 = vld [vmem:[#allocation3] ss:$0 sm:$0xff] }
 0x11d   :  { %v131_v46 = vsel %vm130_vm7, %v1021_v36, %v127_v45 }
 0x11e   :  { %v133_v47 = vmul.f32 %v131_v46, %v99_v18 }
 0x120   :  { %v136_v50 = vmul.f32 %v134_v44, %v133_v47 }
 0x122   :  { %v139_v52 = vadd.f32 %v137_v49, %v136_v50 }
 0x124   :  { %v140_v53 = vpack.c.bf16 %v139_v52, %v138_v51 }
 0x126   :  { %927 = vmatmul.msk.bf16.vlgmr.msra.gmra.mxu0 %vm82_vm0, %v140_v53 }
 0x1a3   :  { %v1291_v56 = vpop.f32.mrf.mxu0 }
 0x1a4   :  { %v175_v57 = vadd.f32 %v174_v54, %v1291_v56  ;;  %v184_v58 = vadd.f32 %v182_v55, %v1291_v56 }
 0x1a6   :  { %v177_v59 = vpack.c.bf16 %v175_v57, %v175_v57  ;;  %v186_v60 = vpack.c.bf16 %v184_v58, %v184_v58 }
 0x1a8   :  { %v203_v61 = vunpack.c.l.b16 %v186_v60  ;;  %v266_v62 = vunpack.c.l.b16 %v177_v59 }
 0x1aa   :  { %v204_v63 = vpack.c.b16 %v203_v61, %v203_v61  ;;  %v267_v1 = vpack.c.b16 %v266_v62, %v266_v62 }
 0x1ab   :  { %v1295_v3 = vpop.f32.mrf.mxu0 }
 0x1ac   :  { %v176_v4 = vadd.f32 %v174_v54, %v1295_v3  ;;  %v185_v5 = vadd.f32 %v182_v55, %v1295_v3  ;;  %270 = vrot.lane.b32.xlu0 %v204_v63, %s1177_s4  ;;  %205 = vrot.lane.b32.xlu2 %v204_v63, %s1178_s9  ;;  %v1014_v54 = vld [vmem:[#allocation3 + $0x1] ss:$0 sm:$0xff] }
 0x1ad   :  { %268 = vrot.lane.b32.xlu1 %v267_v1, %s1179_s10 }
 0x1ae   :  { %v178_v6 = vpack.c.bf16 %v176_v4, %v176_v4  ;;  %v187_v7 = vpack.c.bf16 %v185_v5, %v185_v5 }
 0x1b0   :  { %v458_v8 = vunpack.c.l.b16 %v187_v7  ;;  %v519_v9 = vunpack.c.l.b16 %v178_v6 }
 0x1b2   :  { %v459_v11 = vpack.c.b16 %v458_v8, %v458_v8  ;;  %v520_v12 = vpack.c.b16 %v519_v9, %v519_v9 }
 0x1b4   :  { %394 = vrot.lane.b32.xlu2 %v204_v63, %s1180_s11  ;;  %523 = vrot.lane.b32.xlu0 %v459_v11, %s1177_s4 }
 0x1b5   :  { %521 = vrot.lane.b32.xlu1 %v520_v12, %s1179_s10 }
 0x1bc   :  { %392 = vrot.lane.b32.xlu2 %v267_v1, %s1181_s12  ;;  %460 = vrot.lane.b32.xlu0 %v459_v11, %s1178_s9 }
 0x1bd   :  { %643 = vrot.lane.b32.xlu1 %v520_v12, %s1181_s12 }
 0x1c4   :  { %332 = vrot.lane.b32.xlu2 %v204_v63, %s1182_s14  ;;  %584 = vrot.lane.b32.xlu0 %v459_v11, %s1182_s14 }
 0x1cc   :  { %330 = vrot.lane.b32.xlu2 %v267_v1, %s1183_s5  ;;  %190 = vrot.lane.b32.xlu0 %v1012_v13, %s1169_s13 }
 0x1d4   :  { %645 = vrot.lane.b32.xlu2 %v459_v11, %s1180_s11 }
 0x1dc   :  { %582 = vrot.lane.b32.xlu2 %v520_v12, %s1183_s5 }
 0x206   :  { %v206_v14 = vpop.permute.xlu2 %205 }
 0x207   :  { %v212_v15 = vsel %vm207_vm8, %v206_v14, 0 }
 0x208   :  { %221 = vmatpush.bf16.xpose.msra.mxu1 %v212_v15 }
 0x20e   :  { %v395_v16 = vpop.permute.xlu2 %394 }
 0x20f   :  { %928 = vmatmul.msk.bf16.vlgmr.msra.gmra.mxu1 %vm207_vm8, %v177_v59  ;;  %v400_v22 = vsel %vm207_vm8, %v395_v16, 0 }
 0x216   :  { %v393_v17 = vpop.permute.xlu2 %392 }
 0x21e   :  { %v271_v18 = vpop.permute.xlu0 %270  ;;  %v333_v19 = vpop.permute.xlu2 %332 }
 0x21f   :  { %v276_v20 = vsel %vm207_vm8, %v271_v18, 0  ;;  %v338_v21 = vsel %vm207_vm8, %v333_v19, 0  ;;  %v269_v23 = vpop.permute.xlu1 %268 }
 0x220   :  { %285 = vmatpush.bf16.xpose.msra.mxu3 %v276_v20  ;;  %347 = vmatpush.bf16.xpose.msrb.mxu0 %v338_v21 }
 0x226   :  { %v331_v24 = vpop.permute.xlu2 %330  ;;  %v524_v25 = vpop.permute.xlu0 %523 }
 0x227   :  { %v529_v27 = vsel %vm207_vm8, %v524_v25, 0  ;;  %930 = vmatmul.msk.bf16.vlgmr.msra.gmra.mxu3 %vm207_vm8, %v269_v23  ;;  %932 = vmatmul.msk.bf16.vlgmr.msrb.gmra.mxu0 %vm207_vm8, %v331_v24  ;;  %v522_v39 = vpop.permute.xlu1 %521 }
 0x228   :  { %409 = vmatpush.bf16.xpose.msrb.mxu3 %v400_v22 }
 0x22e   :  { %v461_v28 = vpop.permute.xlu0 %460  ;;  %v646_v30 = vpop.permute.xlu2 %645 }
 0x22f   :  { %v466_v29 = vsel %vm207_vm8, %v461_v28, 0  ;;  %v651_v32 = vsel %vm207_vm8, %v646_v30, 0  ;;  %v644_v41 = vpop.permute.xlu1 %643 }
 0x230   :  { %538 = vmatpush.bf16.xpose.msra.mxu3 %v529_v27  ;;  %475 = vmatpush.bf16.xpose.msra.mxu0 %v466_v29 }
 0x236   :  { %v585_v31 = vpop.permute.xlu0 %584  ;;  %v583_v40 = vpop.permute.xlu2 %582 }
 0x237   :  { %v590_v33 = vsel %vm207_vm8, %v585_v31, 0  ;;  %934 = vmatmul.msk.bf16.vlgmr.msrb.gmra.mxu3 %vm207_vm8, %v393_v17  ;;  %936 = vmatmul.msk.bf16.vlgmr.msra.gmra.mxu0 %vm207_vm8, %v178_v6 }
 0x238   :  { %660 = vmatpush.bf16.xpose.msrb.mxu3 %v651_v32  ;;  %599 = vmatpush.bf16.xpose.msrb.mxu0 %v590_v33 }
 0x23e   :  { %v1316_v34 = vpop.permute.xlu0 %190 }
 0x23f   :  { %v193_v35 = vadd.f32 %v1316_v34, %v1291_v56 }
 0x241   :  { %v195_v36 = vpack.c.bf16 %v193_v35, %v193_v35 }
 0x243   :  { %v240_v37 = vunpack.c.l.b16 %v195_v36 }
 0x245   :  { %v1320_v38 = vpack.c.b16 %v240_v37, %v240_v37  ;;  %v194_v37 = vadd.f32 %v1316_v34, %v1295_v3 }
 0x247   :  { %303 = vrot.lane.b32.xlu0 %v1320_v38, %s1184_s2  ;;  %938 = vmatmul.msk.bf16.vlgmr.msra.gmra.mxu3 %vm207_vm8, %v522_v39 }
 0x248   :  { %940 = vmatmul.msk.bf16.vlgmr.msrb.gmra.mxu0 %vm207_vm8, %v583_v40  ;;  %v196_v40 = vpack.c.bf16 %v194_v37, %v194_v37 }
 0x257   :  { %942 = vmatmul.msk.bf16.vlgmr.msrb.gmra.mxu3 %vm207_vm8, %v644_v41  ;;  %v494_v41 = vunpack.c.l.b16 %v196_v40 }
 0x28c   :  { %v223_v43 = vpop.f32.mrf.mxu1 }
 0x28d   :  { %v224_v44 = vadd.f32 %v1013_v42, %v223_v43 }
 0x28f   :  { %v227_v45 = vsel %vm207_vm8, %v224_v44, -inf }
 0x290   :  { %228 = vmax.xlane.f32.xlu1 %v227_v45 }
 0x294   :  { %v225_v46 = vpop.f32.mrf.mxu1 }
 0x2a4   :  { %v349_v47 = vpop.f32.mrf.mxu0 }
 0x2a5   :  { %v350_v48 = vadd.f32 %v1013_v42, %v349_v47 }
 0x2a7   :  { %v353_v49 = vsel %vm207_vm8, %v350_v48, -inf }
 0x2a8   :  { %354 = vmax.xlane.f32.xlu1 %v353_v49 }
 0x2aa   :  { %v287_v50 = vpop.f32.mrf.mxu3 }
 0x2ab   :  { %v288_v51 = vadd.f32 %v1013_v42, %v287_v50 }
 0x2ac   :  { %v351_v52 = vpop.f32.mrf.mxu0 }
 0x2ad   :  { %v291_v53 = vsel %vm207_vm8, %v288_v51, -inf }
 0x2ae   :  { %292 = vmax.xlane.f32.xlu2 %v291_v53 }
 0x2b2   :  { %v289_v55 = vpop.f32.mrf.mxu3 }
 0x2b4   :  { %v477_v56 = vpop.f32.mrf.mxu0 }
 0x2b5   :  { %v1330_v57 = vadd.f32 %v1014_v54, %v477_v56 }
 0x2b7   :  { %v481_v58 = vsel %vm207_vm8, %v1330_v57, -inf }
 0x2b8   :  { %482 = vmax.xlane.f32.xlu0 %v481_v58 }
 0x2b9   :  { %v304_v30 = vpop.permute.xlu0 %303 }
 0x2ba   :  { %v411_v59 = vpop.f32.mrf.mxu3  ;;  %v309_v33 = vsel %vm247_vm9, %v304_v30, 0 }
 0x2bb   :  { %v1334_v60 = vadd.f32 %v1013_v42, %v411_v59  ;;  %v495_v42 = vpack.c.b16 %v494_v41, %v494_v41 }
 0x2bc   :  { %v479_v61 = vpop.f32.mrf.mxu0 }
 0x2bd   :  { %v415_v62 = vsel %vm207_vm8, %v1334_v60, -inf }
 0x2c0   :  { %416 = vmax.xlane.f32.xlu0 %v415_v62 }
 0x2c2   :  { %v413_v63 = vpop.f32.mrf.mxu3 }
 0x2c5   :  { %v601_v1 = vpop.f32.mrf.mxu0 }
 0x2c6   :  { %v1338_v4 = vadd.f32 %v1014_v54, %v601_v1  ;;  %242 = vrot.lane.b32.xlu2 %v1320_v38, %s1169_s13 }
 0x2c8   :  { %v605_v5 = vsel %vm207_vm8, %v1338_v4, -inf }
 0x2c9   :  { %606 = vmax.xlane.f32.xlu1 %v605_v5 }
 0x2ca   :  { %v540_v6 = vpop.f32.mrf.mxu3 }
 0x2cb   :  { %v1350_v14 = vadd.f32 %v1014_v54, %v540_v6 }
 0x2cd   :  { %v603_v7 = vpop.f32.mrf.mxu0  ;;  %v544_v15 = vsel %vm207_vm8, %v1350_v14, -inf }
 0x2d2   :  { %v542_v8 = vpop.f32.mrf.mxu3 }
 0x2d4   :  { %365 = vrot.lane.b32.xlu0 %v1320_v38, %s1185_s18 }
 0x2da   :  { %v662_v9 = vpop.f32.mrf.mxu3 }
 0x2db   :  { %v1346_v11 = vadd.f32 %v1014_v54, %v662_v9 }
 0x2dd   :  { %v666_v12 = vsel %vm207_vm8, %v1346_v11, -inf }
 0x2de   :  { %667 = vmax.xlane.f32.xlu1 %v666_v12 }
 0x2e2   :  { %v664_v13 = vpop.f32.mrf.mxu3 }
 0x2ef   :  { %545 = vmax.xlane.f32.xlu2 %v544_v15 }
 0x303   :  { %v229_v16 = vpop.xlane.xlu1 %228 }
 0x304   :  { %v230_v17 = vsub.f32 %v224_v44, %v229_v16 }
 0x306   :  { %v231_v18 = vmul.f32 1.442695, %v230_v17 }
 0x308   :  { %1022 = vpow2.f32 %v231_v18 }
 0x30e   :  { %v1354_v19 = vpop.eup %1022 }
 0x30f   :  { %v233_v20 = vsel %vm207_vm8, %v1354_v19, 0.0 }
 0x310   :  { %234 = vadd.xlane.f32.xlu1 %v233_v20 }
 0x31b   :  { %v355_v21 = vpop.xlane.xlu1 %354 }
 0x31c   :  { %v356_v22 = vsub.f32 %v350_v48, %v355_v21 }
 0x31e   :  { %v357_v23 = vmul.f32 1.442695, %v356_v22 }
 0x320   :  { %1024 = vpow2.f32 %v357_v23 }
 0x321   :  { %v293_v24 = vpop.xlane.xlu2 %292 }
 0x322   :  { %v294_v25 = vsub.f32 %v288_v51, %v293_v24 }
 0x324   :  { %v295_v27 = vmul.f32 1.442695, %v294_v25 }
 0x326   :  { %v1358_v28 = vpop.eup %1024  ;;  %1026 = vpow2.f32 %v295_v27 }
 0x327   :  { %v359_v29 = vsel %vm207_vm8, %v1358_v28, 0.0 }
 0x328   :  { %360 = vadd.xlane.f32.xlu2 %v359_v29 }
 0x329   :  { %v243_v31 = vpop.permute.xlu2 %242  ;;  %427 = vrot.lane.b32.xlu1 %v1320_v38, %s1186_s19 }
 0x32a   :  { %v249_v32 = vsel %vm247_vm9, %v243_v31, 0 }
 0x32b   :  { %258 = vmatpush.bf16.msra.mxu2 %v249_v32  ;;  %v483_v39 = vpop.xlane.xlu0 %482 }
 0x32c   :  { %v1366_v35 = vpop.eup %1026  ;;  %v484_v43 = vsub.f32 %v1330_v57, %v483_v39 }
 0x32d   :  { %v297_v36 = vsel %vm207_vm8, %v1366_v35, 0.0 }
 0x32e   :  { %298 = vadd.xlane.f32.xlu0 %v297_v36  ;;  %v485_v44 = vmul.f32 1.442695, %v484_v43 }
 0x32f   :  { %318 = vmatpush.bf16.msrb.mxu2 %v309_v33 }
 0x330   :  { %1028 = vpow2.f32 %v485_v44 }
 0x333   :  { %v417_v38 = vpop.xlane.xlu0 %416 }
 0x334   :  { %v418_v47 = vsub.f32 %v1334_v60, %v417_v38 }
 0x336   :  { %v419_v34 = vmul.f32 1.442695, %v418_v47  ;;  %v1029_v48 = vpop.eup %1028 }
 0x337   :  { %v487_v50 = vsel %vm207_vm8, %v1029_v48, 0.0 }
 0x338   :  { %1030 = vpow2.f32 %v419_v34 }
 0x33c   :  { %v607_v3 = vpop.xlane.xlu1 %606 }
 0x33d   :  { %v608_v49 = vsub.f32 %v1338_v4, %v607_v3 }
 0x33e   :  { %v1031_v53 = vpop.eup %1030 }
 0x33f   :  { %v609_v52 = vmul.f32 1.442695, %v608_v49  ;;  %v421_v55 = vsel %vm207_vm8, %v1031_v53, 0.0 }
 0x340   :  { %556 = vrot.lane.b32.xlu2 %v495_v42, %s1184_s2 }
 0x341   :  { %1032 = vpow2.f32 %v609_v52 }
 0x342   :  { %496 = vrot.lane.b32.xlu0 %v495_v42, %s1169_s13  ;;  %s1187_s13 = smov 8  }
 0x346   :  { %v366_v45 = vpop.permute.xlu0 %365 }
 0x347   :  { %v371_v46 = vsel %vm247_vm9, %v366_v45, 0  ;;  %v1381_v57 = vpop.eup %1032 }
 0x348   :  { %380 = vmatpush.bf16.msrb.mxu1 %v371_v46  ;;  %v611_v59 = vsel %vm207_vm8, %v1381_v57, 0.0 }
 0x351   :  { %v668_v51 = vpop.xlane.xlu1 %667 }
 0x352   :  { %v669_v54 = vsub.f32 %v1346_v11, %v668_v51 }
 0x353   :  { %488 = vadd.xlane.f32.xlu1 %v487_v50 }
 0x354   :  { %v670_v56 = vmul.f32 1.442695, %v669_v54 }
 0x356   :  { %1034 = vpow2.f32 %v670_v56 }
 0x35b   :  { %422 = vadd.xlane.f32.xlu1 %v421_v55 }
 0x35c   :  { %v1386_v61 = vpop.eup %1034 }
 0x35d   :  { %v672_v63 = vsel %vm207_vm8, %v1386_v61, 0.0 }
 0x362   :  { %v546_v58 = vpop.xlane.xlu2 %545 }
 0x363   :  { %v547_v60 = vsub.f32 %v1350_v14, %v546_v58  ;;  %612 = vadd.xlane.f32.xlu1 %v611_v59 }
 0x365   :  { %v548_v62 = vmul.f32 1.442695, %v547_v60 }
 0x367   :  { %1036 = vpow2.f32 %v548_v62 }
 0x369   :  { %673 = vadd.xlane.f32.xlu2 %v672_v63 }
 0x36d   :  { %v1037_v1 = vpop.eup %1036 }
 0x36e   :  { %v550_v4 = vsel %vm207_vm8, %v1037_v1, 0.0 }
 0x36f   :  { %551 = vadd.xlane.f32.xlu0 %v550_v4 }
 0x37c   :  { %678 = vrot.lane.b32.xlu1 %v495_v42, %s1186_s19 }
 0x383   :  { %v235_v5 = vpop.xlane.xlu1 %234  ;;  %617 = vrot.lane.b32.xlu0 %v495_v42, %s1185_s18 }
 0x384   :  { %1038 = vrcp.f32 %v235_v5 }
 0x38a   :  { %v1039_v6 = vpop.eup %1038 }
 0x38b   :  { %v237_v7 = vmul.f32 %v1039_v6, %v1354_v19  ;;  %v982_v6 = vld [vmem:[#allocation6 + $0x8] sm:$0xff] }
 0x38c   :  { %733 = vmatpush.bf16.msra.mxu0 %v982_v6 }
 0x38d   :  { %v238_v8 = vpack.c.bf16 %v237_v7, %v237_v7  ;;  %v981_v7 = vld [vmem:[#allocation6] sm:$0xff] }
 0x38f   :  { %929 = vmatmul.msk.bf16.vlgmr.msra.gmra.mxu2 %vm207_vm8, %v238_v8 }
 0x390   :  { %734 = vmatpush.bf16.msra.mxu0 %v981_v7 }
 0x39b   :  { %v361_v9 = vpop.xlane.xlu2 %360  ;;  %v428_v11 = vpop.permute.xlu1 %427 }
 0x39c   :  { %1040 = vrcp.f32 %v361_v9  ;;  %v433_v12 = vsel %vm247_vm9, %v428_v11, 0 }
 0x39d   :  { %442 = vmatpush.bf16.msra.mxu2 %v433_v12 }
 0x3a1   :  { %v299_v13 = vpop.xlane.xlu0 %298 }
 0x3a2   :  { %v1041_v14 = vpop.eup %1040  ;;  %1042 = vrcp.f32 %v299_v13 }
 0x3a3   :  { %v363_v15 = vmul.f32 %v1041_v14, %v1358_v28  ;;  %v557_v19 = vpop.permute.xlu2 %556 }
 0x3a4   :  { %v562_v21 = vsel %vm247_vm9, %v557_v19, 0 }
 0x3a5   :  { %v364_v16 = vpack.c.bf16 %v363_v15, %v363_v15  ;;  %v711_v15 = vperm.slane %v1283_v26, 4 }
 0x3a7   :  { %933 = vmatmul.msk.bf16.vlgmr.msrb.gmra.mxu1 %vm207_vm8, %v364_v16 }
 0x3a8   :  { %v1043_v17 = vpop.eup %1042 }
 0x3a9   :  { %v301_v18 = vmul.f32 %v1043_v17, %v1366_v35 }
 0x3ab   :  { %v302_v20 = vpack.c.bf16 %v301_v18, %v301_v18 }
 0x3ad   :  { %931 = vmatmul.msk.bf16.vlgmr.msrb.gmra.mxu2 %vm207_vm8, %v302_v20 }
 0x3ae   :  { %571 = vmatpush.bf16.msrb.mxu2 %v562_v21 }
 0x3b4   :  { %v497_v22 = vpop.permute.xlu0 %496 }
 0x3b5   :  { %v502_v23 = vsel %vm247_vm9, %v497_v22, 0 }
 0x3b6   :  { %511 = vmatpush.bf16.msra.mxu1 %v502_v23 }
 0x3c6   :  { %v489_v24 = vpop.xlane.xlu1 %488 }
 0x3c7   :  { %1044 = vrcp.f32 %v489_v24 }
 0x3cd   :  { %v1045_v25 = vpop.eup %1044 }
 0x3ce   :  { %v491_v27 = vmul.f32 %v1045_v25, %v1029_v48  ;;  %v423_v28 = vpop.xlane.xlu1 %422 }
 0x3cf   :  { %1046 = vrcp.f32 %v423_v28 }
 0x3d0   :  { %v492_v29 = vpack.c.bf16 %v491_v27, %v491_v27 }
 0x3d2   :  { %937 = vmatmul.msk.bf16.vlgmr.msra.gmra.mxu1 %vm207_vm8, %v492_v29 }
 0x3d5   :  { %v1047_v30 = vpop.eup %1046 }
 0x3d6   :  { %v425_v31 = vmul.f32 %v1047_v30, %v1031_v53  ;;  %v613_v35 = vpop.xlane.xlu1 %612 }
 0x3d8   :  { %v426_v32 = vpack.c.bf16 %v425_v31, %v425_v31 }
 0x3da   :  { %935 = vmatmul.msk.bf16.vlgmr.msra.gmra.mxu2 %vm207_vm8, %v426_v32 }
 0x3dc   :  { %v674_v39 = vpop.xlane.xlu2 %673 }
 0x3e2   :  { %v552_v33 = vpop.xlane.xlu0 %551 }
 0x3e3   :  { %1048 = vrcp.f32 %v552_v33  ;;  %v984_v33 = vld [vmem:[#allocation8 + $0x8] sm:$0xff] }
 0x3e4   :  { %1050 = vrcp.f32 %v613_v35 }
 0x3e5   :  { %1052 = vrcp.f32 %v674_v39  ;;  %v983_v39 = vld [vmem:[#allocation8] sm:$0xff] }
 0x3e9   :  { %v1049_v36 = vpop.eup %1048 }
 0x3ea   :  { %v554_v37 = vmul.f32 %v1049_v36, %v1037_v1  ;;  %v1051_v38 = vpop.eup %1050 }
 0x3eb   :  { %v615_v43 = vmul.f32 %v1051_v38, %v1381_v57  ;;  %v1053_v44 = vpop.eup %1052 }
 0x3ec   :  { %v555_v40 = vpack.c.bf16 %v554_v37, %v554_v37  ;;  %v676_v3 = vmul.f32 %v1053_v44, %v1386_v61 }
 0x3ed   :  { %v616_v47 = vpack.c.bf16 %v615_v43, %v615_v43 }
 0x3ee   :  { %v679_v41 = vpop.permute.xlu1 %678  ;;  %939 = vmatmul.msk.bf16.vlgmr.msrb.gmra.mxu2 %vm207_vm8, %v555_v40  ;;  %v677_v34 = vpack.c.bf16 %v676_v3, %v676_v3 }
 0x3ef   :  { %v684_v42 = vsel %vm247_vm9, %v679_v41, 0 }
 0x3f0   :  { %693 = vmatpush.bf16.msra.mxu2 %v684_v42 }
 0x3f5   :  { %v618_v45 = vpop.permute.xlu0 %617 }
 0x3f6   :  { %v623_v46 = vsel %vm247_vm9, %v618_v45, 0 }
 0x3f7   :  { %632 = vmatpush.bf16.msrb.mxu1 %v623_v46 }
 0x3fa   :  { %941 = vmatmul.msk.bf16.vlgmr.msrb.gmra.mxu1 %vm207_vm8, %v616_v47 }
 0x3fb   :  { %823 = vmatpush.bf16.msra.mxu1 %v984_v33 }
 0x3fe   :  { %943 = vmatmul.msk.bf16.vlgmr.msra.gmra.mxu2 %vm207_vm8, %v677_v34 }
 0x3ff   :  { %824 = vmatpush.bf16.msra.mxu1 %v983_v39 }
 0x412   :  { %v260_v48 = vpop.f32.mrf.mxu2 }
 0x413   :  { %264 = vst.msk [vmem:[#allocation2] sm:$0xff] %vm207_vm8, %v260_v48 }
 0x41a   :  { %v262_v49 = vpop.f32.mrf.mxu2 }
 0x424   :  { %v382_v50 = vpop.f32.mrf.mxu1 }
 0x425   :  { %387 = vrot.lane.b32.xlu1 %v382_v50, %s1172_s17 }
 0x42c   :  { %v384_v51 = vpop.f32.mrf.mxu1 }
 0x430   :  { %v320_v52 = vpop.f32.mrf.mxu2 }
 0x431   :  { %325 = vrot.lane.b32.xlu0 %v320_v52, %s1187_s13 }
 0x438   :  { %v322_v53 = vpop.f32.mrf.mxu2 }
 0x44f   :  { %v513_v54 = vpop.f32.mrf.mxu1 }
 0x450   :  { %517 = vst.msk [vmem:[#allocation2 + $0x8] sm:$0xff] %vm207_vm8, %v513_v54 }
 0x457   :  { %v515_v55 = vpop.f32.mrf.mxu1 }
 0x458   :  { %v790_v55 = vperm.slane %v1283_v26, 3 }
 0x45d   :  { %v444_v56 = vpop.f32.mrf.mxu2 }
 0x45e   :  { %449 = vrot.lane.b32.xlu2 %v444_v56, %s1188_s20 }
 0x465   :  { %v446_v57 = vpop.f32.mrf.mxu2 }
 0x471   :  { %v573_v58 = vpop.f32.mrf.mxu2 }
 0x472   :  { %578 = vrot.lane.b32.xlu0 %v573_v58, %s1187_s13 }
 0x477   :  { %v634_v59 = vpop.f32.mrf.mxu1 }
 0x479   :  { %v575_v60 = vpop.f32.mrf.mxu2 }
 0x47a   :  { %639 = vrot.lane.b32.xlu0 %v634_v59, %s1172_s17 }
 0x47f   :  { %v636_v61 = vpop.f32.mrf.mxu1 }
 0x481   :  { %v695_v62 = vpop.f32.mrf.mxu2 }
 0x482   :  { %700 = vrot.lane.b32.xlu1 %v695_v62, %s1188_s20  ;;  %v988_v62 = vld [vmem:[%s1471_s7 + $0x18] sm:$0xff] }
 0x483   :  { %885 = vmatpush.bf16.msra.mxu3 %v988_v62 }
 0x489   :  { %v697_v63 = vpop.f32.mrf.mxu2 }
 0x48a   :  { %v987_v63 = vld [vmem:[%s1471_s7 + $0x10] sm:$0xff] }
 0x48b   :  { %886 = vmatpush.bf16.msra.mxu3 %v987_v63 }
 0x497   :  { %v388_v4 = vpop.permute.xlu1 %387 }
 0x4a3   :  { %v326_v1 = vpop.permute.xlu0 %325 }
 0x4a4   :  { %329 = vst.msk [vmem:[#allocation2] sm:$0xff] %vm328_vm10, %v326_v1  ;;  %v986_v1 = vld [vmem:[%s1471_s7 + $0x8] sm:$0xff] }
 0x4a5   :  { %391 = vst.msk [vmem:[#allocation2] sm:$0xff] %vm390_vm11, %v388_v4  ;;  %v1015_v4 = vld [vmem:[%s1467_s3] ss:$0 sm:$0xff]  ;;  %887 = vmatpush.bf16.msra.mxu3 %v986_v1  ;;  %s1189_s3 = smov [#allocation9]  }
 0x4b8   :  { %v450_v5 = vpop.permute.xlu2 %449 }
 0x4b9   :  { %453 = vst.msk [vmem:[#allocation2] sm:$0xff] %vm452_vm12, %v450_v5  ;;  %v985_v5 = vld [vmem:[%s1471_s7] sm:$0xff]  ;;  %s903_s7 = sshll.u32 %s1189_s3, 4  ;;  %s904_s7 = int_to_ptr.vmem [resolvable:$true] %s903_s7 }
 0x4ba   :  { %888 = vmatpush.bf16.msra.mxu3 %v985_v5 }
 0x4c0   :  { %v704_v12 = vld [vmem:[#allocation2] sm:$0xff] }
 0x4e4   :  { %v579_v8 = vpop.permute.xlu0 %578 }
 0x4e5   :  { %581 = vst.msk [vmem:[#allocation2 + $0x8] sm:$0xff] %vm328_vm10, %v579_v8 }
 0x4ec   :  { %v640_v9 = vpop.permute.xlu0 %639 }
 0x4ed   :  { %642 = vst.msk [vmem:[#allocation2 + $0x8] sm:$0xff] %vm390_vm11, %v640_v9 }
 0x4f4   :  { %v701_v11 = vpop.permute.xlu1 %700 }
 0x4f5   :  { %703 = vst.msk [vmem:[#allocation2 + $0x8] sm:$0xff] %vm452_vm12, %v701_v11 }
 0x4fc   :  { %v705_v13 = vld [vmem:[#allocation2 + $0x8] sm:$0xff] }
 0x4fd   :  { %v706_v14 = vpack.c.bf16 %v705_v13, %v704_v12 }
 0x4ff   :  { %952 = vmatmul.msk.bf16.vlgmr.msra.gmra.mxu0 %vm82_vm0, %v706_v14 }
 0x57c   :  { %v736_v16 = vpop.f32.mrf.mxu0 }
 0x57d   :  { %v737_v17 = vadd.f32 %v736_v16, %v711_v15 }
 0x57f   :  { %v1420_v18 = vadd.f32 %v737_v17, %v1254_v0 }
 0x581   :  { %v743_v19 = vsel %vm82_vm0, %v1420_v18, 0.0 }
 0x582   :  { %744 = vadd.xlane.f32.xlu0 %v743_v19 }
 0x584   :  { %v738_v20 = vpop.f32.mrf.mxu0 }
 0x585   :  { %v739_v21 = vadd.f32 %v738_v20, %v711_v15 }
 0x587   :  { %v1425_v22 = vadd.f32 %v739_v21, %v1261_v2 }
 0x589   :  { %v746_v23 = vsel %vm82_vm0, %v1425_v22, 0.0 }
 0x58a   :  { %747 = vadd.xlane.f32.xlu1 %v746_v23 }
 0x5f5   :  { %v745_v24 = vpop.xlane.xlu0 %744 }
 0x5f6   :  { %v749_v25 = vmul.f32 %v745_v24, %v1265_v10 }
 0x5f8   :  { %v751_v27 = vsub.f32 %v1420_v18, %v749_v25 }
 0x5fa   :  { %v753_v0 = vmul.f32 %v751_v27, %v751_v27 }
 0x5fc   :  { %v755_v28 = vsel %vm82_vm0, %v753_v0, 0.0 }
 0x5fd   :  { %v748_v29 = vpop.xlane.xlu1 %747  ;;  %756 = vadd.xlane.f32.xlu2 %v755_v28 }
 0x5fe   :  { %v750_v30 = vmul.f32 %v748_v29, %v1265_v10 }
 0x600   :  { %v752_v31 = vsub.f32 %v1425_v22, %v750_v30 }
 0x602   :  { %v754_v2 = vmul.f32 %v752_v31, %v752_v31 }
 0x604   :  { %v758_v32 = vsel %vm82_vm0, %v754_v2, 0.0 }
 0x605   :  { %759 = vadd.xlane.f32.xlu0 %v758_v32 }
 0x670   :  { %v757_v35 = vpop.xlane.xlu2 %756 }
 0x671   :  { %v761_v36 = vmul.f32 %v757_v35, %v1265_v10 }
 0x673   :  { %v763_v37 = vadd.f32 1e-05, %v761_v36 }
 0x675   :  { %1054 = vrsqrt.f32 %v763_v37  ;;  %vm771_vm14 = vweird.f32 %v763_v37 }
 0x678   :  { %v760_v40 = vpop.xlane.xlu0 %759 }
 0x679   :  { %v762_v41 = vmul.f32 %v760_v40, %v1265_v10  ;;  %v787_v10 = vperm.slane %v1283_v26, 2 }
 0x67b   :  { %v1055_v42 = vpop.eup %1054  ;;  %v764_v38 = vadd.f32 1e-05, %v762_v41 }
 0x67c   :  { %v766_v43 = vmul.f32 %v1055_v42, %v763_v37  ;;  %vm772_vm13 = vweird.f32 %v1055_v42 }
 0x67d   :  { %1056 = vrsqrt.f32 %v764_v38  ;;  %vm773_vm15 = vmor %vm771_vm14, %vm772_vm13  ;;  %vm781_vm2 = vweird.f32 %v764_v38 }
 0x67e   :  { %v767_v44 = vmul.f32 %v1055_v42, %v766_v43 }
 0x680   :  { %v768_v45 = vmul.f32 0.5, %v767_v44 }
 0x682   :  { %v769_v46 = vsub.f32 1.5, %v768_v45 }
 0x683   :  { %v1057_v47 = vpop.eup %1056 }
 0x684   :  { %v770_v3 = vmul.f32 %v1055_v42, %v769_v46  ;;  %v776_v34 = vmul.f32 %v1057_v47, %v764_v38  ;;  %vm782_vm1 = vweird.f32 %v1057_v47 }
 0x685   :  { %vm783_vm3 = vmor %vm781_vm2, %vm782_vm1 }
 0x686   :  { %v777_v48 = vmul.f32 %v1057_v47, %v776_v34  ;;  %v774_v49 = vsel %vm773_vm15, %v1055_v42, %v770_v3 }
 0x687   :  { %v785_v52 = vmul.f32 %v774_v49, %v751_v27  ;;  %v852_v27 = vperm.slane %v1283_v26, 5 }
 0x688   :  { %v778_v50 = vmul.f32 0.5, %v777_v48 }
 0x689   :  { %v788_v56 = vmul.f32 %v787_v10, %v785_v52 }
 0x68a   :  { %v779_v51 = vsub.f32 1.5, %v778_v50 }
 0x68b   :  { %v791_v59 = vadd.f32 %v790_v55, %v788_v56 }
 0x68c   :  { %v780_v53 = vmul.f32 %v1057_v47, %v779_v51 }
 0x68e   :  { %v784_v54 = vsel %vm783_vm3, %v1057_v47, %v780_v53 }
 0x68f   :  { %v786_v57 = vmul.f32 %v784_v54, %v752_v31 }
 0x691   :  { %v789_v58 = vmul.f32 %v787_v10, %v786_v57 }
 0x693   :  { %v792_v60 = vadd.f32 %v790_v55, %v789_v58 }
 0x695   :  { %v793_v61 = vpack.c.bf16 %v792_v60, %v791_v59 }
 0x697   :  { %961 = vmatmul.msk.bf16.vlgmr.msra.gmra.mxu1 %vm82_vm0, %v793_v61 }
 0x714   :  { %v826_v6 = vpop.f32.mrf.mxu1 }
 0x715   :  { %v827_v7 = vadd.f32 %v1015_v4, %v826_v6 }
 0x717   :  { %v831_v8 = vsub.f32 0.0, %v827_v7 }
 0x719   :  { %v833_v9 = vmul.f32 1.442695, %v831_v8 }
 0x71b   :  { %1058 = vpow2.f32 %v833_v9 }
 0x71c   :  { %v828_v11 = vpop.f32.mrf.mxu1 }
 0x71d   :  { %v829_v12 = vadd.f32 %v1015_v4, %v828_v11 }
 0x71f   :  { %v832_v13 = vsub.f32 0.0, %v829_v12 }
 0x721   :  { %v835_v14 = vmul.f32 1.442695, %v832_v13  ;;  %v1059_v15 = vpop.eup %1058 }
 0x722   :  { %v837_v16 = vadd.f32 1.0, %v1059_v15 }
 0x723   :  { %1060 = vpow2.f32 %v835_v14 }
 0x724   :  { %1062 = vrcp.f32 %v837_v16 }
 0x729   :  { %v1061_v17 = vpop.eup %1060 }
 0x72a   :  { %v838_v19 = vadd.f32 1.0, %v1061_v17  ;;  %v1063_v20 = vpop.eup %1062 }
 0x72b   :  { %v841_v23 = vmul.f32 %v1063_v20, %v827_v7 }
 0x72c   :  { %1064 = vrcp.f32 %v838_v19 }
 0x732   :  { %v1065_v21 = vpop.eup %1064 }
 0x733   :  { %v842_v24 = vmul.f32 %v1065_v21, %v829_v12 }
 0x735   :  { %v843_v25 = vpack.c.bf16 %v842_v24, %v841_v23 }
 0x737   :  { %978 = vmatmul.msk.bf16.vlgmr.msra.gmra.mxu3 %vm877_vm4, %v843_v25 }
 0x7ba   :  { %v890_v0 = vpop.f32.mrf.mxu3 }
 0x7bb   :  { %v891_v28 = vadd.f32 %v890_v0, %v852_v27 }
 0x7bd   :  { %v895_v29 = vadd.f32 %v891_v28, %v1420_v18 }
 0x7bf   :  { %897 = vst.msk [vmem:[#allocation9] sm:$0xff] %vm82_vm0, %v895_v29 }
 0x7c2   :  { %v892_v30 = vpop.f32.mrf.mxu3 }
 0x7c3   :  { %v893_v31 = vadd.f32 %v892_v30, %v852_v27 }
 0x7c5   :  { %v896_v2 = vadd.f32 %v893_v31, %v1425_v22 }
 0x7c7   :  { %898 = vst.msk [vmem:[#allocation9 + $0x8] sm:$0xff] %vm82_vm0, %v896_v2 }
 0x7c8   :  { %911 = dma.vmem_to_hbm [thread:$0]  %s904_s7, 256, %s906_s29, [#allocation5], %s1190_s30, %s1190_s30, %s1187_s13  }
 0x7c9   :  { %1166 = dma.done.wait [#allocation5], 256  }
 0x7ca   :  { %1167 = vsyncadd [#allocation5], 4294967040 }
 0x7cb   :  { %916 = vsyncpa [#allocation4], 1 }
 0x7cc   :  { %917 = vsyncpa [#allocation7], 1 }
 0x7cd   :  { %918 = vsyncpa [#allocation5], 1 }

</bundles_post_ra>
